<compile_context>
chip_gen: v7x
topology: tpu7x:2x2x1
jax: 0.10.0
libtpu: 0.0.40
codegen_flags: <defaults>
</compile_context>

<pallas_src>
import functools

import jax
import jax.numpy as jnp
from jax import lax
from jax.experimental import pallas as pl
from jax.experimental.pallas import tpu as pltpu


# -----------------------------------------------------------------------------
# tiling / VMEM helpers
# -----------------------------------------------------------------------------
def _round_up(x, m):
    return -(-x // m) * m


def _vmem_limit(buffer_bytes, floor=32 << 20, cap=48 << 20):
    """Explicit scoped-VMEM request from the real double-buffered footprint."""
    need = int(buffer_bytes * 1.3) + (2 << 20)
    return int(min(cap, max(floor, need)))


def _pick_scl_tiles(n_rows, n_cols, itemsize, target_bytes=4 << 20,
                    max_rows=1024):
    """(row_tile, col_tile): ~target_bytes per input block.

    Prefers full-width rows (single column pass).  If even one sublane-group
    of full rows exceeds the budget, tiles the lane axis too (the kernel
    streams per-row moments across column tiles).
    """
    sub = max(8, 32 // max(1, itemsize))          # 8 f32, 16 bf16, 32 int8
    rows_pad = _round_up(n_rows, sub)
    full_row_bytes = max(1, n_cols * itemsize)

    tr = (target_bytes // full_row_bytes) // sub * sub
    tr = min(max(tr, sub), rows_pad, max_rows)
    if tr * full_row_bytes <= (target_bytes * 5) // 4:
        return int(tr), int(n_cols)

    # Full rows don't fit -> column tiling (streaming moments path).
    tr = sub
    tc = (target_bytes // (sub * itemsize)) // 128 * 128
    tc = max(128, tc)
    if tc >= n_cols:
        tc = n_cols
    return int(tr), int(tc)


def _pick_ce_pix_tile(n_pix, n_classes, itemsize, target_bytes=4 << 20):
    """Pixel (lane) tile: full extent if it fits, else a multiple of 128."""
    per_pix = max(1, n_classes * itemsize + 8)     # logits + target + out
    tp = (target_bytes // per_pix) // 128 * 128
    tp = max(128, tp)
    if tp >= n_pix:
        return int(n_pix)
    return int(tp)


# -----------------------------------------------------------------------------
# SCL loss kernel: streaming per-row moments over column tiles.
#   outputs per-row partials:
#     out_c[r] = sum_s (a[r,s]-b[r,s])^2
#     out_d[r] = sum_s (norm(a)[r,s]-norm(b)[r,s])^2   (if compute_d)
# -----------------------------------------------------------------------------
def _scl_kernel(a_ref, b_ref, out_c_ref, out_d_ref,
                sa_ref, sb_ref, saa_ref, sbb_ref, sab_ref, sdd_ref,
                *, n_cols_total, ragged_cols, compute_d):
    k = pl.program_id(1)
    last_k = pl.num_programs(1) - 1

    @pl.when(k == 0)
    def _init():
        sdd_ref[...] = jnp.zeros_like(sdd_ref)
        if compute_d:
            sa_ref[...] = jnp.zeros_like(sa_ref)
            sb_ref[...] = jnp.zeros_like(sb_ref)
            saa_ref[...] = jnp.zeros_like(saa_ref)
            sbb_ref[...] = jnp.zeros_like(sbb_ref)
            sab_ref[...] = jnp.zeros_like(sab_ref)

    a = a_ref[...].astype(jnp.float32)            # (tr, tc)
    b = b_ref[...].astype(jnp.float32)

    if ragged_cols:                                # static: only if S % tc != 0
        tc = a.shape[1]
        col = lax.broadcasted_iota(jnp.int32, a.shape, 1) + k * tc
        in_range = col < n_cols_total
        a = jnp.where(in_range, a, 0.0)
        b = jnp.where(in_range, b, 0.0)

    d = a - b
    sdd_ref[...] += jnp.sum(d * d, axis=1, keepdims=True)
    if compute_d:
        sa_ref[...] += jnp.sum(a, axis=1, keepdims=True)
        sb_ref[...] += jnp.sum(b, axis=1, keepdims=True)
        saa_ref[...] += jnp.sum(a * a, axis=1, keepdims=True)
        sbb_ref[...] += jnp.sum(b * b, axis=1, keepdims=True)
        sab_ref[...] += jnp.sum(a * b, axis=1, keepdims=True)

    @pl.when(k == last_k)
    def _finalize():
        out_c_ref[...] = sdd_ref[...]
        if compute_d:
            inv_n = jnp.float32(1.0 / n_cols_total)
            sa = sa_ref[...]
            sb = sb_ref[...]
            ssq_a = jnp.maximum(saa_ref[...] - sa * sa * inv_n, 0.0)
            ssq_b = jnp.maximum(sbb_ref[...] - sb * sb * inv_n, 0.0)
            cross = sab_ref[...] - sa * sb * inv_n
            # 1/(||x|| + 1e-8)  ~=  rsqrt(||x||^2 + 1e-16): single EUP op.
            inv_na = lax.rsqrt(ssq_a + jnp.float32(1e-16))
            inv_nb = lax.rsqrt(ssq_b + jnp.float32(1e-16))
            out_d_ref[...] = (ssq_a * inv_na * inv_na
                              + ssq_b * inv_nb * inv_nb
                              - 2.0 * cross * (inv_na * inv_nb))
        else:
            out_d_ref[...] = jnp.zeros_like(out_d_ref)


def _scl_sums(A, B, compute_d, row_tile=None, col_tile=None):
    bn, c, h, w = A.shape
    R = bn * c
    S = h * w
    a2 = A.reshape(R, S)                           # original dtype (no upcast)
    b2 = B.reshape(R, S)
    itemsize = max(a2.dtype.itemsize, b2.dtype.itemsize)

    tr, tc = _pick_scl_tiles(R, S, itemsize)
    if row_tile is not None:
        tr = int(row_tile)
    if col_tile is not None:
        tc = int(col_tile)

    n_row_tiles = int(pl.cdiv(R, tr))
    n_col_tiles = int(pl.cdiv(S, tc))
    r_pad = n_row_tiles * tr
    ragged_cols = (S % tc) != 0

    kernel = functools.partial(_scl_kernel, n_cols_total=S,
                               ragged_cols=ragged_cols, compute_d=compute_d)

    # real footprint: 2 inputs x 2 pipeline buffers x block + outputs + scratch
    in_block = tr * tc * itemsize
    scratch_b = 6 * tr * 128 * 4                   # (tr,1) pads lanes to 128
    out_b = 2 * 2 * tr * 128 * 4
    vmem = _vmem_limit(4 * in_block + scratch_b + out_b)

    out_c, out_d = pl.pallas_call(
        kernel,
        out_shape=(jax.ShapeDtypeStruct((r_pad, 1), jnp.float32),
                   jax.ShapeDtypeStruct((r_pad, 1), jnp.float32)),
        grid=(n_row_tiles, n_col_tiles),
        in_specs=[pl.BlockSpec((tr, tc), lambda i, k: (i, k)),
                  pl.BlockSpec((tr, tc), lambda i, k: (i, k))],
        out_specs=[pl.BlockSpec((tr, 1), lambda i, k: (i, 0)),
                   pl.BlockSpec((tr, 1), lambda i, k: (i, 0))],
        scratch_shapes=[pltpu.VMEM((tr, 1), jnp.float32)] * 6,
        compiler_params=pltpu.CompilerParams(
            dimension_semantics=("parallel", "arbitrary"),
            vmem_limit_bytes=vmem),
    )(a2, b2)

    # padded rows (>= R) may hold garbage; slice them off before reducing.
    sum_c = jnp.sum(out_c[:R, 0])
    sum_d = jnp.sum(out_d[:R, 0])
    return sum_c, sum_d


def scl_loss(args, A, B, layer=None, row_tile=None, col_tile=None):
    """compute_SCL_loss_AE equivalent.  A, B are NCHW arrays."""
    compute_d = (layer != 'end') and (float(args.loss_scale_D) != 0.0)
    sum_c, sum_d = _scl_sums(A, B, compute_d,
                             row_tile=row_tile, col_tile=col_tile)
    n = float(A.shape[0] * A.shape[1] * A.shape[2] * A.shape[3])
    h = float(A.shape[2])
    loss = (sum_c / n) * h * float(args.loss_scale_C)
    if compute_d:
        loss = loss + (sum_d / n) * h * float(args.loss_scale_D)
    return loss


# -----------------------------------------------------------------------------
# Pixel-wise cross-entropy kernel (nn.CrossEntropyLoss, mean over valid pixels)
# emits the masked per-pixel loss map; the tiny sum / count run in plain JAX.
# -----------------------------------------------------------------------------
def _ce_kernel(logits_ref, tgt_ref, out_ref, *, n_pix, ignore_index, ragged):
    l = logits_ref[0].astype(jnp.float32)          # (C, tp)
    t = tgt_ref[0]                                 # (1, tp) int32

    valid = t != ignore_index
    if ragged:                                     # static: only if S % tp != 0
        tp = l.shape[1]
        pix = lax.broadcasted_iota(jnp.int32, t.shape, 1) + pl.program_id(1) * tp
        valid = valid & (pix < n_pix)

    m = jnp.max(l, axis=0, keepdims=True)
    lse = m + jnp.log(jnp.sum(jnp.exp(l - m), axis=0, keepdims=True))
    cls_ids = lax.broadcasted_iota(jnp.int32, l.shape, 0)
    sel = jnp.sum(jnp.where(cls_ids == t, l, 0.0), axis=0, keepdims=True)

    # keep the jnp.where (NOT valid * (...)): padded lanes may hold inf/NaN.
    out_ref[0] = jnp.where(valid, lse - sel, 0.0)


def cross_entropy_loss(logits_nchw, target_nhw, ignore_index=-100,
                       pix_tile=None):
    """nn.CrossEntropyLoss(logits (B,C,H,W), target (B,H,W) int) — mean."""
    b, c, h, w = logits_nchw.shape
    S = h * w
    logits = logits_nchw.reshape(b, c, S)          # reshape only: no transpose
    target = target_nhw.reshape(b, 1, S).astype(jnp.int32)

    tp = pix_tile if pix_tile is not None else _pick_ce_pix_tile(
        S, c, logits.dtype.itemsize)
    tp = int(tp)
    npt = int(pl.cdiv(S, tp))
    ragged = (S % tp) != 0

    kernel = functools.partial(_ce_kernel, n_pix=S,
                               ignore_index=ignore_index, ragged=ragged)

    blk = c * tp * logits.dtype.itemsize + 8 * tp * 4 + 8 * tp * 4
    vmem = _vmem_limit(2 * blk)

    per_pix = pl.pallas_call(
        kernel,
        out_shape=jax.ShapeDtypeStruct((b, 1, S), jnp.float32),
        grid=(b, npt),
        in_specs=[pl.BlockSpec((1, c, tp), lambda i, j: (i, 0, j)),
                  pl.BlockSpec((1, 1, tp), lambda i, j: (i, 0, j))],
        out_specs=pl.BlockSpec((1, 1, tp), lambda i, j: (i, 0, j)),
        compiler_params=pltpu.CompilerParams(
            dimension_semantics=("parallel", "parallel"),
            vmem_limit_bytes=vmem),
    )(logits, target)

    count = jnp.sum((target != ignore_index).astype(jnp.float32))
    return jnp.sum(per_pix) / count


# -----------------------------------------------------------------------------
# Module equivalent
# -----------------------------------------------------------------------------
class Args:
    def __init__(self, loss_scale_C=1.0, loss_scale_D=0.5, method='local'):
        self.loss_scale_C = loss_scale_C
        self.loss_scale_D = loss_scale_D
        self.method = method


class C2LossConvSegmentationPallas:
    def __init__(self, args):
        self.args = args
        self.method = args.method
        # jit whole loss; no host sync inside the loss path.
        self._local = jax.jit(self._local_impl)
        self._final = jax.jit(self._final_impl)

    def _local_impl(self, activations, signals, target):
        losses = []
        for act, sig in zip(activations[1:-1], signals[1:-1]):
            if act.ndim == 4 and sig.ndim == 2:
                sig = sig.reshape(sig.shape[0], sig.shape[1],
                                  act.shape[2], act.shape[3])
            if act.ndim == 2 and sig.ndim == 4:
                act = act.reshape(act.shape[0], act.shape[1],
                                  sig.shape[2], sig.shape[3])
            losses.append(scl_loss(self.args, act, sig))
        losses.append(scl_loss(self.args, activations[0], signals[0],
                               layer='end'))
        ce = cross_entropy_loss(activations[-1],
                                target[:, 0].astype(jnp.int32))
        losses.append(ce)
        # NOTE: returns device scalars (no .item() host pull).
        return sum(losses), ce

    def _final_impl(self, activations, signals, target):
        ce = cross_entropy_loss(activations[-1], target.astype(jnp.int32))
        return ce, ce

    def __call__(self, activations, signals, target=None, method='final'):
        if method == 'local':
            return self._local(activations, signals, target)
        elif method == 'final':
            return self._final(activations, signals, target)


# -----------------------------------------------------------------------------
# Pure-JAX reference (for correctness check)
# -----------------------------------------------------------------------------
def _ref_scl(args, A, B, layer=None):
    mse = jnp.mean((A - B) ** 2)
    loss = mse * A.shape[2] * args.loss_scale_C
    if layer == 'end' or args.loss_scale_D == 0:
        return loss

    def norm(x):
        x = x - jnp.mean(x, axis=(2, 3), keepdims=True)
        return x / (jnp.sqrt(jnp.sum(x ** 2, axis=(2, 3), keepdims=True)) + 1e-8)

    An, Bn = norm(A), norm(B)
    return loss + jnp.mean((An - Bn) ** 2) * A.shape[2] * args.loss_scale_D


def _ref_ce(logits, target):
    logp = jax.nn.log_softmax(logits, axis=1)            # (B,C,H,W)
    onehot = jax.nn.one_hot(target, logits.shape[1], axis=1)
    return -jnp.mean(jnp.sum(logp * onehot, axis=1))


# -----------------------------------------------------------------------------
if __name__ == "__main__":
    key = jax.random.PRNGKey(0)
    ks = jax.random.split(key, 10)

    B, H, W = 2, 16, 16
    NUM_CLASSES = 5

    # activations: [reconstruction, hidden1, hidden2, segmentation logits]
    activations = [
        jax.random.normal(ks[0], (B, 3, H, W), jnp.float32),
        jax.random.normal(ks[1], (B, 4, H, W), jnp.float32),
        jax.random.normal(ks[2], (B, 8, 8, 8), jnp.float32),
        jax.random.normal(ks[3], (B, NUM_CLASSES, H, W), jnp.float32),
    ]
    signals = [
        jax.random.normal(ks[4], (B, 3, H, W), jnp.float32),
        jax.random.normal(ks[5], (B, 4, H, W), jnp.float32),
        jax.random.normal(ks[6], (B, 8, 8, 8), jnp.float32),
        jnp.zeros((B, NUM_CLASSES, H, W), jnp.float32),   # unused (like PyTorch)
    ]
    target = jax.random.randint(ks[7], (B, 1, H, W), 0, NUM_CLASSES,
                                dtype=jnp.int32)

    args = Args(loss_scale_C=1.0, loss_scale_D=0.5, method='local')
    loss_mod = C2LossConvSegmentationPallas(args)

    total_loss, ce_item = loss_mod(activations, signals, target=target,
                                   method='local')
    total_loss, ce_item = jax.block_until_ready((total_loss, ce_item))

    # reference check
    ref_losses = [_ref_scl(args, activations[1], signals[1]),
                  _ref_scl(args, activations[2], signals[2]),
                  _ref_scl(args, activations[0], signals[0], layer='end'),
                  _ref_ce(activations[-1], target[:, 0])]
    ref_total = sum(ref_losses)

    assert jnp.allclose(total_loss, ref_total, rtol=1e-4, atol=1e-4), \
        (total_loss, ref_total)
    assert jnp.allclose(ce_item, ref_losses[-1], rtol=1e-4, atol=1e-4), \
        (ce_item, ref_losses[-1])

    # 'final' branch
    final_loss, _ = loss_mod(activations, signals, target=target[:, 0],
                             method='final')
    final_loss = jax.block_until_ready(final_loss)
    assert jnp.allclose(final_loss, ref_losses[-1], rtol=1e-4, atol=1e-4)

    # explicitly exercise the column-tiled / ragged paths of the SCL kernel
    A = jax.random.normal(ks[8], (2, 3, 16, 32), jnp.float32)   # R=6, S=512
    Bv = jax.random.normal(ks[9], (2, 3, 16, 32), jnp.float32)
    tiled = scl_loss(args, A, Bv, row_tile=8, col_tile=384)     # ragged rows+cols
    tiled = jax.block_until_ready(tiled)
    ref_t = _ref_scl(args, A, Bv)
    assert jnp.allclose(tiled, ref_t, rtol=1e-4, atol=1e-4), (tiled, ref_t)

    # explicitly exercise the ragged pixel-tile path of the CE kernel
    logits_r = jax.random.normal(ks[3], (2, NUM_CLASSES, 16, 20), jnp.float32)
    tgt_r = jax.random.randint(ks[7], (2, 16, 20), 0, NUM_CLASSES,
                               dtype=jnp.int32)
    ce_r = jax.block_until_ready(
        cross_entropy_loss(logits_r, tgt_r, pix_tile=256))      # S=320, tp=256
    ref_ce_r = _ref_ce(logits_r, tgt_r)
    assert jnp.allclose(ce_r, ref_ce_r, rtol=1e-4, atol=1e-4), (ce_r, ref_ce_r)

    print("KERNEL_OK")
</pallas_src>

<mosaic_0001>
module attributes {stable_mosaic.version = 11 : i64} {
  func.func @_scl_kernel(%arg0: i32, %arg1: i32, %arg2: memref<16x64xf32, #tpu.memory_space<vmem>>, %arg3: memref<16x64xf32, #tpu.memory_space<vmem>>, %arg4: memref<16x1xf32, #tpu.memory_space<vmem>>, %arg5: memref<16x1xf32, #tpu.memory_space<vmem>>, %arg6: memref<16x1xf32, #tpu.memory_space<vmem>>, %arg7: memref<16x1xf32, #tpu.memory_space<vmem>>, %arg8: memref<16x1xf32, #tpu.memory_space<vmem>>, %arg9: memref<16x1xf32, #tpu.memory_space<vmem>>, %arg10: memref<16x1xf32, #tpu.memory_space<vmem>>, %arg11: memref<16x1xf32, #tpu.memory_space<vmem>>) attributes {dimension_semantics = [#tpu.dimension_semantics<parallel>, #tpu.dimension_semantics<arbitrary>], iteration_bounds = array<i64: 1, 1>, scalar_prefetch = 0 : i64, scratch_operands = 6 : i64, tpu.core_type = #tpu.core_type<tc>, window_params = [{transform_indices = @transform_0, window_bounds = array<i64: 16, 64>}, {transform_indices = @transform_1, window_bounds = array<i64: 16, 64>}, {transform_indices = @transform_2, window_bounds = array<i64: 16, 1>}, {transform_indices = @transform_3, window_bounds = array<i64: 16, 1>}]} {
    %c0_i32 = arith.constant 0 : i32
    %0 = arith.cmpi eq, %arg1, %c0_i32 : i32
    %1 = arith.extui %0 : i1 to i32
    %c0_i32_0 = arith.constant 0 : i32
    %2 = arith.cmpi ne, %1, %c0_i32_0 : i32
    scf.if %2 {
      %cst_35 = arith.constant 0.000000e+00 : f32
      %43 = vector.broadcast %cst_35 : f32 to vector<16x1xf32>
      %c0_36 = arith.constant 0 : index
      %c0_37 = arith.constant 0 : index
      %44 = vector.load %arg11[%c0_36, %c0_37] : memref<16x1xf32, #tpu.memory_space<vmem>>, vector<16x1xf32>
      tpu.vector_store %arg11[%c0_36, %c0_37], %43 {strides = array<i32>} : memref<16x1xf32, #tpu.memory_space<vmem>>, vector<16x1xf32>,
      %cst_38 = arith.constant 0.000000e+00 : f32
      %45 = vector.broadcast %cst_38 : f32 to vector<16x1xf32>
      %c0_39 = arith.constant 0 : index
      %c0_40 = arith.constant 0 : index
      %46 = vector.load %arg6[%c0_39, %c0_40] : memref<16x1xf32, #tpu.memory_space<vmem>>, vector<16x1xf32>
      tpu.vector_store %arg6[%c0_39, %c0_40], %45 {strides = array<i32>} : memref<16x1xf32, #tpu.memory_space<vmem>>, vector<16x1xf32>,
      %cst_41 = arith.constant 0.000000e+00 : f32
      %47 = vector.broadcast %cst_41 : f32 to vector<16x1xf32>
      %c0_42 = arith.constant 0 : index
      %c0_43 = arith.constant 0 : index
      %48 = vector.load %arg7[%c0_42, %c0_43] : memref<16x1xf32, #tpu.memory_space<vmem>>, vector<16x1xf32>
      tpu.vector_store %arg7[%c0_42, %c0_43], %47 {strides = array<i32>} : memref<16x1xf32, #tpu.memory_space<vmem>>, vector<16x1xf32>,
      %cst_44 = arith.constant 0.000000e+00 : f32
      %49 = vector.broadcast %cst_44 : f32 to vector<16x1xf32>
      %c0_45 = arith.constant 0 : index
      %c0_46 = arith.constant 0 : index
      %50 = vector.load %arg8[%c0_45, %c0_46] : memref<16x1xf32, #tpu.memory_space<vmem>>, vector<16x1xf32>
      tpu.vector_store %arg8[%c0_45, %c0_46], %49 {strides = array<i32>} : memref<16x1xf32, #tpu.memory_space<vmem>>, vector<16x1xf32>,
      %cst_47 = arith.constant 0.000000e+00 : f32
      %51 = vector.broadcast %cst_47 : f32 to vector<16x1xf32>
      %c0_48 = arith.constant 0 : index
      %c0_49 = arith.constant 0 : index
      %52 = vector.load %arg9[%c0_48, %c0_49] : memref<16x1xf32, #tpu.memory_space<vmem>>, vector<16x1xf32>
      tpu.vector_store %arg9[%c0_48, %c0_49], %51 {strides = array<i32>} : memref<16x1xf32, #tpu.memory_space<vmem>>, vector<16x1xf32>,
      %cst_50 = arith.constant 0.000000e+00 : f32
      %53 = vector.broadcast %cst_50 : f32 to vector<16x1xf32>
      %c0_51 = arith.constant 0 : index
      %c0_52 = arith.constant 0 : index
      %54 = vector.load %arg10[%c0_51, %c0_52] : memref<16x1xf32, #tpu.memory_space<vmem>>, vector<16x1xf32>
      tpu.vector_store %arg10[%c0_51, %c0_52], %53 {strides = array<i32>} : memref<16x1xf32, #tpu.memory_space<vmem>>, vector<16x1xf32>,
    } else {
    }
    %c0 = arith.constant 0 : index
    %c0_1 = arith.constant 0 : index
    %3 = vector.load %arg2[%c0, %c0_1] : memref<16x64xf32, #tpu.memory_space<vmem>>, vector<16x64xf32>
    %c0_2 = arith.constant 0 : index
    %c0_3 = arith.constant 0 : index
    %4 = vector.load %arg3[%c0_2, %c0_3] : memref<16x64xf32, #tpu.memory_space<vmem>>, vector<16x64xf32>
    %5 = arith.subf %3, %4 : vector<16x64xf32>
    %c0_4 = arith.constant 0 : index
    %c0_5 = arith.constant 0 : index
    %6 = vector.load %arg11[%c0_4, %c0_5] : memref<16x1xf32, #tpu.memory_space<vmem>>, vector<16x1xf32>
    %7 = arith.mulf %5, %5 : vector<16x64xf32>
    %cst = arith.constant dense<0.000000e+00> : vector<16xf32>
    %8 = vector.multi_reduction <add>, %7, %cst [1] : vector<16x64xf32> to vector<16xf32>
    %9 = vector.shape_cast %8 : vector<16xf32> to vector<16x1xf32>
    %10 = arith.addf %6, %9 : vector<16x1xf32>
    %c0_6 = arith.constant 0 : index
    %c0_7 = arith.constant 0 : index
    %11 = vector.load %arg11[%c0_6, %c0_7] : memref<16x1xf32, #tpu.memory_space<vmem>>, vector<16x1xf32>
    tpu.vector_store %arg11[%c0_6, %c0_7], %10 {strides = array<i32>} : memref<16x1xf32, #tpu.memory_space<vmem>>, vector<16x1xf32>,
    %c0_8 = arith.constant 0 : index
    %c0_9 = arith.constant 0 : index
    %12 = vector.load %arg6[%c0_8, %c0_9] : memref<16x1xf32, #tpu.memory_space<vmem>>, vector<16x1xf32>
    %cst_10 = arith.constant dense<0.000000e+00> : vector<16xf32>
    %13 = vector.multi_reduction <add>, %3, %cst_10 [1] : vector<16x64xf32> to vector<16xf32>
    %14 = vector.shape_cast %13 : vector<16xf32> to vector<16x1xf32>
    %15 = arith.addf %12, %14 : vector<16x1xf32>
    %c0_11 = arith.constant 0 : index
    %c0_12 = arith.constant 0 : index
    %16 = vector.load %arg6[%c0_11, %c0_12] : memref<16x1xf32, #tpu.memory_space<vmem>>, vector<16x1xf32>
    tpu.vector_store %arg6[%c0_11, %c0_12], %15 {strides = array<i32>} : memref<16x1xf32, #tpu.memory_space<vmem>>, vector<16x1xf32>,
    %c0_13 = arith.constant 0 : index
    %c0_14 = arith.constant 0 : index
    %17 = vector.load %arg7[%c0_13, %c0_14] : memref<16x1xf32, #tpu.memory_space<vmem>>, vector<16x1xf32>
    %cst_15 = arith.constant dense<0.000000e+00> : vector<16xf32>
    %18 = vector.multi_reduction <add>, %4, %cst_15 [1] : vector<16x64xf32> to vector<16xf32>
    %19 = vector.shape_cast %18 : vector<16xf32> to vector<16x1xf32>
    %20 = arith.addf %17, %19 : vector<16x1xf32>
    %c0_16 = arith.constant 0 : index
    %c0_17 = arith.constant 0 : index
    %21 = vector.load %arg7[%c0_16, %c0_17] : memref<16x1xf32, #tpu.memory_space<vmem>>, vector<16x1xf32>
    tpu.vector_store %arg7[%c0_16, %c0_17], %20 {strides = array<i32>} : memref<16x1xf32, #tpu.memory_space<vmem>>, vector<16x1xf32>,
    %c0_18 = arith.constant 0 : index
    %c0_19 = arith.constant 0 : index
    %22 = vector.load %arg8[%c0_18, %c0_19] : memref<16x1xf32, #tpu.memory_space<vmem>>, vector<16x1xf32>
    %23 = arith.mulf %3, %3 : vector<16x64xf32>
    %cst_20 = arith.constant dense<0.000000e+00> : vector<16xf32>
    %24 = vector.multi_reduction <add>, %23, %cst_20 [1] : vector<16x64xf32> to vector<16xf32>
    %25 = vector.shape_cast %24 : vector<16xf32> to vector<16x1xf32>
    %26 = arith.addf %22, %25 : vector<16x1xf32>
    %c0_21 = arith.constant 0 : index
    %c0_22 = arith.constant 0 : index
    %27 = vector.load %arg8[%c0_21, %c0_22] : memref<16x1xf32, #tpu.memory_space<vmem>>, vector<16x1xf32>
    tpu.vector_store %arg8[%c0_21, %c0_22], %26 {strides = array<i32>} : memref<16x1xf32, #tpu.memory_space<vmem>>, vector<16x1xf32>,
    %c0_23 = arith.constant 0 : index
    %c0_24 = arith.constant 0 : index
    %28 = vector.load %arg9[%c0_23, %c0_24] : memref<16x1xf32, #tpu.memory_space<vmem>>, vector<16x1xf32>
    %29 = arith.mulf %4, %4 : vector<16x64xf32>
    %cst_25 = arith.constant dense<0.000000e+00> : vector<16xf32>
    %30 = vector.multi_reduction <add>, %29, %cst_25 [1] : vector<16x64xf32> to vector<16xf32>
    %31 = vector.shape_cast %30 : vector<16xf32> to vector<16x1xf32>
    %32 = arith.addf %28, %31 : vector<16x1xf32>
    %c0_26 = arith.constant 0 : index
    %c0_27 = arith.constant 0 : index
    %33 = vector.load %arg9[%c0_26, %c0_27] : memref<16x1xf32, #tpu.memory_space<vmem>>, vector<16x1xf32>
    tpu.vector_store %arg9[%c0_26, %c0_27], %32 {strides = array<i32>} : memref<16x1xf32, #tpu.memory_space<vmem>>, vector<16x1xf32>,
    %c0_28 = arith.constant 0 : index
    %c0_29 = arith.constant 0 : index
    %34 = vector.load %arg10[%c0_28, %c0_29] : memref<16x1xf32, #tpu.memory_space<vmem>>, vector<16x1xf32>
    %35 = arith.mulf %3, %4 : vector<16x64xf32>
    %cst_30 = arith.constant dense<0.000000e+00> : vector<16xf32>
    %36 = vector.multi_reduction <add>, %35, %cst_30 [1] : vector<16x64xf32> to vector<16xf32>
    %37 = vector.shape_cast %36 : vector<16xf32> to vector<16x1xf32>
    %38 = arith.addf %34, %37 : vector<16x1xf32>
    %c0_31 = arith.constant 0 : index
    %c0_32 = arith.constant 0 : index
    %39 = vector.load %arg10[%c0_31, %c0_32] : memref<16x1xf32, #tpu.memory_space<vmem>>, vector<16x1xf32>
    tpu.vector_store %arg10[%c0_31, %c0_32], %38 {strides = array<i32>} : memref<16x1xf32, #tpu.memory_space<vmem>>, vector<16x1xf32>,
    %c0_i32_33 = arith.constant 0 : i32
    %40 = arith.cmpi eq, %arg1, %c0_i32_33 : i32
    %41 = arith.extui %40 : i1 to i32
    %c0_i32_34 = arith.constant 0 : i32
    %42 = arith.cmpi ne, %41, %c0_i32_34 : i32
    scf.if %42 {
      %c0_35 = arith.constant 0 : index
      %c0_36 = arith.constant 0 : index
      %43 = vector.load %arg11[%c0_35, %c0_36] : memref<16x1xf32, #tpu.memory_space<vmem>>, vector<16x1xf32>
      %c0_37 = arith.constant 0 : index
      %c0_38 = arith.constant 0 : index
      %44 = vector.load %arg4[%c0_37, %c0_38] : memref<16x1xf32, #tpu.memory_space<vmem>>, vector<16x1xf32>
      tpu.vector_store %arg4[%c0_37, %c0_38], %43 {strides = array<i32>} : memref<16x1xf32, #tpu.memory_space<vmem>>, vector<16x1xf32>,
      %c0_39 = arith.constant 0 : index
      %c0_40 = arith.constant 0 : index
      %45 = vector.load %arg6[%c0_39, %c0_40] : memref<16x1xf32, #tpu.memory_space<vmem>>, vector<16x1xf32>
      %c0_41 = arith.constant 0 : index
      %c0_42 = arith.constant 0 : index
      %46 = vector.load %arg7[%c0_41, %c0_42] : memref<16x1xf32, #tpu.memory_space<vmem>>, vector<16x1xf32>
      %c0_43 = arith.constant 0 : index
      %c0_44 = arith.constant 0 : index
      %47 = vector.load %arg8[%c0_43, %c0_44] : memref<16x1xf32, #tpu.memory_space<vmem>>, vector<16x1xf32>
      %48 = arith.mulf %45, %45 : vector<16x1xf32>
      %cst_45 = arith.constant 1.562500e-02 : f32
      %49 = vector.broadcast %cst_45 : f32 to vector<16x1xf32>
      %50 = arith.mulf %48, %49 : vector<16x1xf32>
      %51 = arith.subf %47, %50 : vector<16x1xf32>
      %cst_46 = arith.constant 0.000000e+00 : f32
      %52 = vector.broadcast %cst_46 : f32 to vector<16x1xf32>
      %53 = arith.maximumf %51, %52 : vector<16x1xf32>
      %c0_47 = arith.constant 0 : index
      %c0_48 = arith.constant 0 : index
      %54 = vector.load %arg9[%c0_47, %c0_48] : memref<16x1xf32, #tpu.memory_space<vmem>>, vector<16x1xf32>
      %55 = arith.mulf %46, %46 : vector<16x1xf32>
      %cst_49 = arith.constant 1.562500e-02 : f32
      %56 = vector.broadcast %cst_49 : f32 to vector<16x1xf32>
      %57 = arith.mulf %55, %56 : vector<16x1xf32>
      %58 = arith.subf %54, %57 : vector<16x1xf32>
      %cst_50 = arith.constant 0.000000e+00 : f32
      %59 = vector.broadcast %cst_50 : f32 to vector<16x1xf32>
      %60 = arith.maximumf %58, %59 : vector<16x1xf32>
      %c0_51 = arith.constant 0 : index
      %c0_52 = arith.constant 0 : index
      %61 = vector.load %arg10[%c0_51, %c0_52] : memref<16x1xf32, #tpu.memory_space<vmem>>, vector<16x1xf32>
      %62 = arith.mulf %45, %46 : vector<16x1xf32>
      %cst_53 = arith.constant 1.562500e-02 : f32
      %63 = vector.broadcast %cst_53 : f32 to vector<16x1xf32>
      %64 = arith.mulf %62, %63 : vector<16x1xf32>
      %65 = arith.subf %61, %64 : vector<16x1xf32>
      %cst_54 = arith.constant 1.000000e-16 : f32
      %66 = vector.broadcast %cst_54 : f32 to vector<16x1xf32>
      %67 = arith.addf %53, %66 : vector<16x1xf32>
      %68 = math.rsqrt %67 : vector<16x1xf32>
      %cst_55 = arith.constant 1.000000e-16 : f32
      %69 = vector.broadcast %cst_55 : f32 to vector<16x1xf32>
      %70 = arith.addf %60, %69 : vector<16x1xf32>
      %71 = math.rsqrt %70 : vector<16x1xf32>
      %72 = arith.mulf %53, %68 : vector<16x1xf32>
      %73 = arith.mulf %72, %68 : vector<16x1xf32>
      %74 = arith.mulf %60, %71 : vector<16x1xf32>
      %75 = arith.mulf %74, %71 : vector<16x1xf32>
      %76 = arith.addf %73, %75 : vector<16x1xf32>
      %cst_56 = arith.constant 2.000000e+00 : f32
      %77 = vector.broadcast %cst_56 : f32 to vector<16x1xf32>
      %78 = arith.mulf %77, %65 : vector<16x1xf32>
      %79 = arith.mulf %68, %71 : vector<16x1xf32>
      %80 = arith.mulf %78, %79 : vector<16x1xf32>
      %81 = arith.subf %76, %80 : vector<16x1xf32>
      %c0_57 = arith.constant 0 : index
      %c0_58 = arith.constant 0 : index
      %82 = vector.load %arg5[%c0_57, %c0_58] : memref<16x1xf32, #tpu.memory_space<vmem>>, vector<16x1xf32>
      tpu.vector_store %arg5[%c0_57, %c0_58], %81 {strides = array<i32>} : memref<16x1xf32, #tpu.memory_space<vmem>>, vector<16x1xf32>,
    } else {
    }
    return
  }
  func.func @transform_0(%arg0: i32, %arg1: i32) -> (i32, i32) {
    %c0_i32 = arith.constant 0 : i32
    return %arg0, %arg1 : i32, i32
  }
  func.func @transform_1(%arg0: i32, %arg1: i32) -> (i32, i32) {
    %c0_i32 = arith.constant 0 : i32
    return %arg0, %arg1 : i32, i32
  }
  func.func @transform_2(%arg0: i32, %arg1: i32) -> (i32, i32) {
    %c0_i32 = arith.constant 0 : i32
    %c0_i32_0 = arith.constant 0 : i32
    return %arg0, %c0_i32 : i32, i32
  }
  func.func @transform_3(%arg0: i32, %arg1: i32) -> (i32, i32) {
    %c0_i32 = arith.constant 0 : i32
    %c0_i32_0 = arith.constant 0 : i32
    return %arg0, %c0_i32 : i32, i32
  }
}

module attributes {stable_mosaic.version = 11 : i64} {
  func.func @_scl_kernel(%arg0: i32, %arg1: i32, %arg2: memref<8x256xf32, #tpu.memory_space<vmem>>, %arg3: memref<8x256xf32, #tpu.memory_space<vmem>>, %arg4: memref<8x1xf32, #tpu.memory_space<vmem>>, %arg5: memref<8x1xf32, #tpu.memory_space<vmem>>, %arg6: memref<8x1xf32, #tpu.memory_space<vmem>>, %arg7: memref<8x1xf32, #tpu.memory_space<vmem>>, %arg8: memref<8x1xf32, #tpu.memory_space<vmem>>, %arg9: memref<8x1xf32, #tpu.memory_space<vmem>>, %arg10: memref<8x1xf32, #tpu.memory_space<vmem>>, %arg11: memref<8x1xf32, #tpu.memory_space<vmem>>) attributes {dimension_semantics = [#tpu.dimension_semantics<parallel>, #tpu.dimension_semantics<arbitrary>], iteration_bounds = array<i64: 1, 1>, scalar_prefetch = 0 : i64, scratch_operands = 6 : i64, tpu.core_type = #tpu.core_type<tc>, window_params = [{transform_indices = @transform_0, window_bounds = array<i64: 8, 256>}, {transform_indices = @transform_1, window_bounds = array<i64: 8, 256>}, {transform_indices = @transform_2, window_bounds = array<i64: 8, 1>}, {transform_indices = @transform_3, window_bounds = array<i64: 8, 1>}]} {
    %c0_i32 = arith.constant 0 : i32
    %0 = arith.cmpi eq, %arg1, %c0_i32 : i32
    %1 = arith.extui %0 : i1 to i32
    %c0_i32_0 = arith.constant 0 : i32
    %2 = arith.cmpi ne, %1, %c0_i32_0 : i32
    scf.if %2 {
      %cst_35 = arith.constant 0.000000e+00 : f32
      %43 = vector.broadcast %cst_35 : f32 to vector<8x1xf32>
      %c0_36 = arith.constant 0 : index
      %c0_37 = arith.constant 0 : index
      %44 = vector.load %arg11[%c0_36, %c0_37] : memref<8x1xf32, #tpu.memory_space<vmem>>, vector<8x1xf32>
      tpu.vector_store %arg11[%c0_36, %c0_37], %43 {strides = array<i32>} : memref<8x1xf32, #tpu.memory_space<vmem>>, vector<8x1xf32>,
      %cst_38 = arith.constant 0.000000e+00 : f32
      %45 = vector.broadcast %cst_38 : f32 to vector<8x1xf32>
      %c0_39 = arith.constant 0 : index
      %c0_40 = arith.constant 0 : index
      %46 = vector.load %arg6[%c0_39, %c0_40] : memref<8x1xf32, #tpu.memory_space<vmem>>, vector<8x1xf32>
      tpu.vector_store %arg6[%c0_39, %c0_40], %45 {strides = array<i32>} : memref<8x1xf32, #tpu.memory_space<vmem>>, vector<8x1xf32>,
      %cst_41 = arith.constant 0.000000e+00 : f32
      %47 = vector.broadcast %cst_41 : f32 to vector<8x1xf32>
      %c0_42 = arith.constant 0 : index
      %c0_43 = arith.constant 0 : index
      %48 = vector.load %arg7[%c0_42, %c0_43] : memref<8x1xf32, #tpu.memory_space<vmem>>, vector<8x1xf32>
      tpu.vector_store %arg7[%c0_42, %c0_43], %47 {strides = array<i32>} : memref<8x1xf32, #tpu.memory_space<vmem>>, vector<8x1xf32>,
      %cst_44 = arith.constant 0.000000e+00 : f32
      %49 = vector.broadcast %cst_44 : f32 to vector<8x1xf32>
      %c0_45 = arith.constant 0 : index
      %c0_46 = arith.constant 0 : index
      %50 = vector.load %arg8[%c0_45, %c0_46] : memref<8x1xf32, #tpu.memory_space<vmem>>, vector<8x1xf32>
      tpu.vector_store %arg8[%c0_45, %c0_46], %49 {strides = array<i32>} : memref<8x1xf32, #tpu.memory_space<vmem>>, vector<8x1xf32>,
      %cst_47 = arith.constant 0.000000e+00 : f32
      %51 = vector.broadcast %cst_47 : f32 to vector<8x1xf32>
      %c0_48 = arith.constant 0 : index
      %c0_49 = arith.constant 0 : index
      %52 = vector.load %arg9[%c0_48, %c0_49] : memref<8x1xf32, #tpu.memory_space<vmem>>, vector<8x1xf32>
      tpu.vector_store %arg9[%c0_48, %c0_49], %51 {strides = array<i32>} : memref<8x1xf32, #tpu.memory_space<vmem>>, vector<8x1xf32>,
      %cst_50 = arith.constant 0.000000e+00 : f32
      %53 = vector.broadcast %cst_50 : f32 to vector<8x1xf32>
      %c0_51 = arith.constant 0 : index
      %c0_52 = arith.constant 0 : index
      %54 = vector.load %arg10[%c0_51, %c0_52] : memref<8x1xf32, #tpu.memory_space<vmem>>, vector<8x1xf32>
      tpu.vector_store %arg10[%c0_51, %c0_52], %53 {strides = array<i32>} : memref<8x1xf32, #tpu.memory_space<vmem>>, vector<8x1xf32>,
    } else {
    }
    %c0 = arith.constant 0 : index
    %c0_1 = arith.constant 0 : index
    %3 = vector.load %arg2[%c0, %c0_1] : memref<8x256xf32, #tpu.memory_space<vmem>>, vector<8x256xf32>
    %c0_2 = arith.constant 0 : index
    %c0_3 = arith.constant 0 : index
    %4 = vector.load %arg3[%c0_2, %c0_3] : memref<8x256xf32, #tpu.memory_space<vmem>>, vector<8x256xf32>
    %5 = arith.subf %3, %4 : vector<8x256xf32>
    %c0_4 = arith.constant 0 : index
    %c0_5 = arith.constant 0 : index
    %6 = vector.load %arg11[%c0_4, %c0_5] : memref<8x1xf32, #tpu.memory_space<vmem>>, vector<8x1xf32>
    %7 = arith.mulf %5, %5 : vector<8x256xf32>
    %cst = arith.constant dense<0.000000e+00> : vector<8xf32>
    %8 = vector.multi_reduction <add>, %7, %cst [1] : vector<8x256xf32> to vector<8xf32>
    %9 = vector.shape_cast %8 : vector<8xf32> to vector<8x1xf32>
    %10 = arith.addf %6, %9 : vector<8x1xf32>
    %c0_6 = arith.constant 0 : index
    %c0_7 = arith.constant 0 : index
    %11 = vector.load %arg11[%c0_6, %c0_7] : memref<8x1xf32, #tpu.memory_space<vmem>>, vector<8x1xf32>
    tpu.vector_store %arg11[%c0_6, %c0_7], %10 {strides = array<i32>} : memref<8x1xf32, #tpu.memory_space<vmem>>, vector<8x1xf32>,
    %c0_8 = arith.constant 0 : index
    %c0_9 = arith.constant 0 : index
    %12 = vector.load %arg6[%c0_8, %c0_9] : memref<8x1xf32, #tpu.memory_space<vmem>>, vector<8x1xf32>
    %cst_10 = arith.constant dense<0.000000e+00> : vector<8xf32>
    %13 = vector.multi_reduction <add>, %3, %cst_10 [1] : vector<8x256xf32> to vector<8xf32>
    %14 = vector.shape_cast %13 : vector<8xf32> to vector<8x1xf32>
    %15 = arith.addf %12, %14 : vector<8x1xf32>
    %c0_11 = arith.constant 0 : index
    %c0_12 = arith.constant 0 : index
    %16 = vector.load %arg6[%c0_11, %c0_12] : memref<8x1xf32, #tpu.memory_space<vmem>>, vector<8x1xf32>
    tpu.vector_store %arg6[%c0_11, %c0_12], %15 {strides = array<i32>} : memref<8x1xf32, #tpu.memory_space<vmem>>, vector<8x1xf32>,
    %c0_13 = arith.constant 0 : index
    %c0_14 = arith.constant 0 : index
    %17 = vector.load %arg7[%c0_13, %c0_14] : memref<8x1xf32, #tpu.memory_space<vmem>>, vector<8x1xf32>
    %cst_15 = arith.constant dense<0.000000e+00> : vector<8xf32>
    %18 = vector.multi_reduction <add>, %4, %cst_15 [1] : vector<8x256xf32> to vector<8xf32>
    %19 = vector.shape_cast %18 : vector<8xf32> to vector<8x1xf32>
    %20 = arith.addf %17, %19 : vector<8x1xf32>
    %c0_16 = arith.constant 0 : index
    %c0_17 = arith.constant 0 : index
    %21 = vector.load %arg7[%c0_16, %c0_17] : memref<8x1xf32, #tpu.memory_space<vmem>>, vector<8x1xf32>
    tpu.vector_store %arg7[%c0_16, %c0_17], %20 {strides = array<i32>} : memref<8x1xf32, #tpu.memory_space<vmem>>, vector<8x1xf32>,
    %c0_18 = arith.constant 0 : index
    %c0_19 = arith.constant 0 : index
    %22 = vector.load %arg8[%c0_18, %c0_19] : memref<8x1xf32, #tpu.memory_space<vmem>>, vector<8x1xf32>
    %23 = arith.mulf %3, %3 : vector<8x256xf32>
    %cst_20 = arith.constant dense<0.000000e+00> : vector<8xf32>
    %24 = vector.multi_reduction <add>, %23, %cst_20 [1] : vector<8x256xf32> to vector<8xf32>
    %25 = vector.shape_cast %24 : vector<8xf32> to vector<8x1xf32>
    %26 = arith.addf %22, %25 : vector<8x1xf32>
    %c0_21 = arith.constant 0 : index
    %c0_22 = arith.constant 0 : index
    %27 = vector.load %arg8[%c0_21, %c0_22] : memref<8x1xf32, #tpu.memory_space<vmem>>, vector<8x1xf32>
    tpu.vector_store %arg8[%c0_21, %c0_22], %26 {strides = array<i32>} : memref<8x1xf32, #tpu.memory_space<vmem>>, vector<8x1xf32>,
    %c0_23 = arith.constant 0 : index
    %c0_24 = arith.constant 0 : index
    %28 = vector.load %arg9[%c0_23, %c0_24] : memref<8x1xf32, #tpu.memory_space<vmem>>, vector<8x1xf32>
    %29 = arith.mulf %4, %4 : vector<8x256xf32>
    %cst_25 = arith.constant dense<0.000000e+00> : vector<8xf32>
    %30 = vector.multi_reduction <add>, %29, %cst_25 [1] : vector<8x256xf32> to vector<8xf32>
    %31 = vector.shape_cast %30 : vector<8xf32> to vector<8x1xf32>
    %32 = arith.addf %28, %31 : vector<8x1xf32>
    %c0_26 = arith.constant 0 : index
    %c0_27 = arith.constant 0 : index
    %33 = vector.load %arg9[%c0_26, %c0_27] : memref<8x1xf32, #tpu.memory_space<vmem>>, vector<8x1xf32>
    tpu.vector_store %arg9[%c0_26, %c0_27], %32 {strides = array<i32>} : memref<8x1xf32, #tpu.memory_space<vmem>>, vector<8x1xf32>,
    %c0_28 = arith.constant 0 : index
    %c0_29 = arith.constant 0 : index
    %34 = vector.load %arg10[%c0_28, %c0_29] : memref<8x1xf32, #tpu.memory_space<vmem>>, vector<8x1xf32>
    %35 = arith.mulf %3, %4 : vector<8x256xf32>
    %cst_30 = arith.constant dense<0.000000e+00> : vector<8xf32>
    %36 = vector.multi_reduction <add>, %35, %cst_30 [1] : vector<8x256xf32> to vector<8xf32>
    %37 = vector.shape_cast %36 : vector<8xf32> to vector<8x1xf32>
    %38 = arith.addf %34, %37 : vector<8x1xf32>
    %c0_31 = arith.constant 0 : index
    %c0_32 = arith.constant 0 : index
    %39 = vector.load %arg10[%c0_31, %c0_32] : memref<8x1xf32, #tpu.memory_space<vmem>>, vector<8x1xf32>
    tpu.vector_store %arg10[%c0_31, %c0_32], %38 {strides = array<i32>} : memref<8x1xf32, #tpu.memory_space<vmem>>, vector<8x1xf32>,
    %c0_i32_33 = arith.constant 0 : i32
    %40 = arith.cmpi eq, %arg1, %c0_i32_33 : i32
    %41 = arith.extui %40 : i1 to i32
    %c0_i32_34 = arith.constant 0 : i32
    %42 = arith.cmpi ne, %41, %c0_i32_34 : i32
    scf.if %42 {
      %c0_35 = arith.constant 0 : index
      %c0_36 = arith.constant 0 : index
      %43 = vector.load %arg11[%c0_35, %c0_36] : memref<8x1xf32, #tpu.memory_space<vmem>>, vector<8x1xf32>
      %c0_37 = arith.constant 0 : index
      %c0_38 = arith.constant 0 : index
      %44 = vector.load %arg4[%c0_37, %c0_38] : memref<8x1xf32, #tpu.memory_space<vmem>>, vector<8x1xf32>
      tpu.vector_store %arg4[%c0_37, %c0_38], %43 {strides = array<i32>} : memref<8x1xf32, #tpu.memory_space<vmem>>, vector<8x1xf32>,
      %c0_39 = arith.constant 0 : index
      %c0_40 = arith.constant 0 : index
      %45 = vector.load %arg6[%c0_39, %c0_40] : memref<8x1xf32, #tpu.memory_space<vmem>>, vector<8x1xf32>
      %c0_41 = arith.constant 0 : index
      %c0_42 = arith.constant 0 : index
      %46 = vector.load %arg7[%c0_41, %c0_42] : memref<8x1xf32, #tpu.memory_space<vmem>>, vector<8x1xf32>
      %c0_43 = arith.constant 0 : index
      %c0_44 = arith.constant 0 : index
      %47 = vector.load %arg8[%c0_43, %c0_44] : memref<8x1xf32, #tpu.memory_space<vmem>>, vector<8x1xf32>
      %48 = arith.mulf %45, %45 : vector<8x1xf32>
      %cst_45 = arith.constant 3.906250e-03 : f32
      %49 = vector.broadcast %cst_45 : f32 to vector<8x1xf32>
      %50 = arith.mulf %48, %49 : vector<8x1xf32>
      %51 = arith.subf %47, %50 : vector<8x1xf32>
      %cst_46 = arith.constant 0.000000e+00 : f32
      %52 = vector.broadcast %cst_46 : f32 to vector<8x1xf32>
      %53 = arith.maximumf %51, %52 : vector<8x1xf32>
      %c0_47 = arith.constant 0 : index
      %c0_48 = arith.constant 0 : index
      %54 = vector.load %arg9[%c0_47, %c0_48] : memref<8x1xf32, #tpu.memory_space<vmem>>, vector<8x1xf32>
      %55 = arith.mulf %46, %46 : vector<8x1xf32>
      %cst_49 = arith.constant 3.906250e-03 : f32
      %56 = vector.broadcast %cst_49 : f32 to vector<8x1xf32>
      %57 = arith.mulf %55, %56 : vector<8x1xf32>
      %58 = arith.subf %54, %57 : vector<8x1xf32>
      %cst_50 = arith.constant 0.000000e+00 : f32
      %59 = vector.broadcast %cst_50 : f32 to vector<8x1xf32>
      %60 = arith.maximumf %58, %59 : vector<8x1xf32>
      %c0_51 = arith.constant 0 : index
      %c0_52 = arith.constant 0 : index
      %61 = vector.load %arg10[%c0_51, %c0_52] : memref<8x1xf32, #tpu.memory_space<vmem>>, vector<8x1xf32>
      %62 = arith.mulf %45, %46 : vector<8x1xf32>
      %cst_53 = arith.constant 3.906250e-03 : f32
      %63 = vector.broadcast %cst_53 : f32 to vector<8x1xf32>
      %64 = arith.mulf %62, %63 : vector<8x1xf32>
      %65 = arith.subf %61, %64 : vector<8x1xf32>
      %cst_54 = arith.constant 1.000000e-16 : f32
      %66 = vector.broadcast %cst_54 : f32 to vector<8x1xf32>
      %67 = arith.addf %53, %66 : vector<8x1xf32>
      %68 = math.rsqrt %67 : vector<8x1xf32>
      %cst_55 = arith.constant 1.000000e-16 : f32
      %69 = vector.broadcast %cst_55 : f32 to vector<8x1xf32>
      %70 = arith.addf %60, %69 : vector<8x1xf32>
      %71 = math.rsqrt %70 : vector<8x1xf32>
      %72 = arith.mulf %53, %68 : vector<8x1xf32>
      %73 = arith.mulf %72, %68 : vector<8x1xf32>
      %74 = arith.mulf %60, %71 : vector<8x1xf32>
      %75 = arith.mulf %74, %71 : vector<8x1xf32>
      %76 = arith.addf %73, %75 : vector<8x1xf32>
      %cst_56 = arith.constant 2.000000e+00 : f32
      %77 = vector.broadcast %cst_56 : f32 to vector<8x1xf32>
      %78 = arith.mulf %77, %65 : vector<8x1xf32>
      %79 = arith.mulf %68, %71 : vector<8x1xf32>
      %80 = arith.mulf %78, %79 : vector<8x1xf32>
      %81 = arith.subf %76, %80 : vector<8x1xf32>
      %c0_57 = arith.constant 0 : index
      %c0_58 = arith.constant 0 : index
      %82 = vector.load %arg5[%c0_57, %c0_58] : memref<8x1xf32, #tpu.memory_space<vmem>>, vector<8x1xf32>
      tpu.vector_store %arg5[%c0_57, %c0_58], %81 {strides = array<i32>} : memref<8x1xf32, #tpu.memory_space<vmem>>, vector<8x1xf32>,
    } else {
    }
    return
  }
  func.func @transform_0(%arg0: i32, %arg1: i32) -> (i32, i32) {
    %c0_i32 = arith.constant 0 : i32
    return %arg0, %arg1 : i32, i32
  }
  func.func @transform_1(%arg0: i32, %arg1: i32) -> (i32, i32) {
    %c0_i32 = arith.constant 0 : i32
    return %arg0, %arg1 : i32, i32
  }
  func.func @transform_2(%arg0: i32, %arg1: i32) -> (i32, i32) {
    %c0_i32 = arith.constant 0 : i32
    %c0_i32_0 = arith.constant 0 : i32
    return %arg0, %c0_i32 : i32, i32
  }
  func.func @transform_3(%arg0: i32, %arg1: i32) -> (i32, i32) {
    %c0_i32 = arith.constant 0 : i32
    %c0_i32_0 = arith.constant 0 : i32
    return %arg0, %c0_i32 : i32, i32
  }
}

module attributes {stable_mosaic.version = 11 : i64} {
  func.func @_scl_kernel(%arg0: i32, %arg1: i32, %arg2: memref<8x256xf32, #tpu.memory_space<vmem>>, %arg3: memref<8x256xf32, #tpu.memory_space<vmem>>, %arg4: memref<8x1xf32, #tpu.memory_space<vmem>>, %arg5: memref<8x1xf32, #tpu.memory_space<vmem>>, %arg6: memref<8x1xf32, #tpu.memory_space<vmem>>, %arg7: memref<8x1xf32, #tpu.memory_space<vmem>>, %arg8: memref<8x1xf32, #tpu.memory_space<vmem>>, %arg9: memref<8x1xf32, #tpu.memory_space<vmem>>, %arg10: memref<8x1xf32, #tpu.memory_space<vmem>>, %arg11: memref<8x1xf32, #tpu.memory_space<vmem>>) attributes {dimension_semantics = [#tpu.dimension_semantics<parallel>, #tpu.dimension_semantics<arbitrary>], iteration_bounds = array<i64: 1, 1>, scalar_prefetch = 0 : i64, scratch_operands = 6 : i64, tpu.core_type = #tpu.core_type<tc>, window_params = [{transform_indices = @transform_0, window_bounds = array<i64: 8, 256>}, {transform_indices = @transform_1, window_bounds = array<i64: 8, 256>}, {transform_indices = @transform_2, window_bounds = array<i64: 8, 1>}, {transform_indices = @transform_3, window_bounds = array<i64: 8, 1>}]} {
    %c0_i32 = arith.constant 0 : i32
    %0 = arith.cmpi eq, %arg1, %c0_i32 : i32
    %1 = arith.extui %0 : i1 to i32
    %c0_i32_0 = arith.constant 0 : i32
    %2 = arith.cmpi ne, %1, %c0_i32_0 : i32
    scf.if %2 {
      %cst_10 = arith.constant 0.000000e+00 : f32
      %15 = vector.broadcast %cst_10 : f32 to vector<8x1xf32>
      %c0_11 = arith.constant 0 : index
      %c0_12 = arith.constant 0 : index
      %16 = vector.load %arg11[%c0_11, %c0_12] : memref<8x1xf32, #tpu.memory_space<vmem>>, vector<8x1xf32>
      tpu.vector_store %arg11[%c0_11, %c0_12], %15 {strides = array<i32>} : memref<8x1xf32, #tpu.memory_space<vmem>>, vector<8x1xf32>,
    } else {
    }
    %c0 = arith.constant 0 : index
    %c0_1 = arith.constant 0 : index
    %3 = vector.load %arg2[%c0, %c0_1] : memref<8x256xf32, #tpu.memory_space<vmem>>, vector<8x256xf32>
    %c0_2 = arith.constant 0 : index
    %c0_3 = arith.constant 0 : index
    %4 = vector.load %arg3[%c0_2, %c0_3] : memref<8x256xf32, #tpu.memory_space<vmem>>, vector<8x256xf32>
    %5 = arith.subf %3, %4 : vector<8x256xf32>
    %c0_4 = arith.constant 0 : index
    %c0_5 = arith.constant 0 : index
    %6 = vector.load %arg11[%c0_4, %c0_5] : memref<8x1xf32, #tpu.memory_space<vmem>>, vector<8x1xf32>
    %7 = arith.mulf %5, %5 : vector<8x256xf32>
    %cst = arith.constant dense<0.000000e+00> : vector<8xf32>
    %8 = vector.multi_reduction <add>, %7, %cst [1] : vector<8x256xf32> to vector<8xf32>
    %9 = vector.shape_cast %8 : vector<8xf32> to vector<8x1xf32>
    %10 = arith.addf %6, %9 : vector<8x1xf32>
    %c0_6 = arith.constant 0 : index
    %c0_7 = arith.constant 0 : index
    %11 = vector.load %arg11[%c0_6, %c0_7] : memref<8x1xf32, #tpu.memory_space<vmem>>, vector<8x1xf32>
    tpu.vector_store %arg11[%c0_6, %c0_7], %10 {strides = array<i32>} : memref<8x1xf32, #tpu.memory_space<vmem>>, vector<8x1xf32>,
    %c0_i32_8 = arith.constant 0 : i32
    %12 = arith.cmpi eq, %arg1, %c0_i32_8 : i32
    %13 = arith.extui %12 : i1 to i32
    %c0_i32_9 = arith.constant 0 : i32
    %14 = arith.cmpi ne, %13, %c0_i32_9 : i32
    scf.if %14 {
      %c0_10 = arith.constant 0 : index
      %c0_11 = arith.constant 0 : index
      %15 = vector.load %arg11[%c0_10, %c0_11] : memref<8x1xf32, #tpu.memory_space<vmem>>, vector<8x1xf32>
      %c0_12 = arith.constant 0 : index
      %c0_13 = arith.constant 0 : index
      %16 = vector.load %arg4[%c0_12, %c0_13] : memref<8x1xf32, #tpu.memory_space<vmem>>, vector<8x1xf32>
      tpu.vector_store %arg4[%c0_12, %c0_13], %15 {strides = array<i32>} : memref<8x1xf32, #tpu.memory_space<vmem>>, vector<8x1xf32>,
      %cst_14 = arith.constant 0.000000e+00 : f32
      %17 = vector.broadcast %cst_14 : f32 to vector<8x1xf32>
      %c0_15 = arith.constant 0 : index
      %c0_16 = arith.constant 0 : index
      %18 = vector.load %arg5[%c0_15, %c0_16] : memref<8x1xf32, #tpu.memory_space<vmem>>, vector<8x1xf32>
      tpu.vector_store %arg5[%c0_15, %c0_16], %17 {strides = array<i32>} : memref<8x1xf32, #tpu.memory_space<vmem>>, vector<8x1xf32>,
    } else {
    }
    return
  }
  func.func @transform_0(%arg0: i32, %arg1: i32) -> (i32, i32) {
    %c0_i32 = arith.constant 0 : i32
    return %arg0, %arg1 : i32, i32
  }
  func.func @transform_1(%arg0: i32, %arg1: i32) -> (i32, i32) {
    %c0_i32 = arith.constant 0 : i32
    return %arg0, %arg1 : i32, i32
  }
  func.func @transform_2(%arg0: i32, %arg1: i32) -> (i32, i32) {
    %c0_i32 = arith.constant 0 : i32
    %c0_i32_0 = arith.constant 0 : i32
    return %arg0, %c0_i32 : i32, i32
  }
  func.func @transform_3(%arg0: i32, %arg1: i32) -> (i32, i32) {
    %c0_i32 = arith.constant 0 : i32
    %c0_i32_0 = arith.constant 0 : i32
    return %arg0, %c0_i32 : i32, i32
  }
}

module attributes {stable_mosaic.version = 11 : i64} {
  func.func @_ce_kernel(%arg0: i32, %arg1: i32, %arg2: memref<1x5x256xf32, #tpu.memory_space<vmem>>, %arg3: memref<1x1x256xi32, #tpu.memory_space<vmem>>, %arg4: memref<1x1x256xf32, #tpu.memory_space<vmem>>) attributes {dimension_semantics = [#tpu.dimension_semantics<parallel>, #tpu.dimension_semantics<parallel>], iteration_bounds = array<i64: 2, 1>, scalar_prefetch = 0 : i64, scratch_operands = 0 : i64, tpu.core_type = #tpu.core_type<tc>, window_params = [{transform_indices = @transform_0, window_bounds = array<i64: 1, 5, 256>}, {transform_indices = @transform_1, window_bounds = array<i64: 1, 1, 256>}, {transform_indices = @transform_2, window_bounds = array<i64: 1, 1, 256>}]} {
    %c0 = arith.constant 0 : index
    %c0_0 = arith.constant 0 : index
    %c0_1 = arith.constant 0 : index
    %0 = vector.load %arg2[%c0, %c0_0, %c0_1] : memref<1x5x256xf32, #tpu.memory_space<vmem>>, vector<1x5x256xf32>
    %1 = vector.shape_cast %0 : vector<1x5x256xf32> to vector<5x256xf32>
    %c0_2 = arith.constant 0 : index
    %c0_3 = arith.constant 0 : index
    %c0_4 = arith.constant 0 : index
    %2 = vector.load %arg3[%c0_2, %c0_3, %c0_4] : memref<1x1x256xi32, #tpu.memory_space<vmem>>, vector<1x1x256xi32>
    %3 = vector.shape_cast %2 : vector<1x1x256xi32> to vector<1x256xi32>
    %c-100_i32 = arith.constant -100 : i32
    %4 = vector.broadcast %c-100_i32 : i32 to vector<1x256xi32>
    %5 = arith.cmpi ne, %3, %4 : vector<1x256xi32>
    %cst = arith.constant dense<0xFF800000> : vector<256xf32>
    %6 = vector.multi_reduction <maximumf>, %1, %cst [0] : vector<5x256xf32> to vector<256xf32>
    %7 = vector.shape_cast %6 : vector<256xf32> to vector<1x256xf32>
    %8 = vector.broadcast %7 : vector<1x256xf32> to vector<5x256xf32>
    %9 = arith.subf %1, %8 : vector<5x256xf32>
    %10 = math.exp %9 : vector<5x256xf32>
    %cst_5 = arith.constant dense<0.000000e+00> : vector<256xf32>
    %11 = vector.multi_reduction <add>, %10, %cst_5 [0] : vector<5x256xf32> to vector<256xf32>
    %12 = vector.shape_cast %11 : vector<256xf32> to vector<1x256xf32>
    %13 = math.log %12 : vector<1x256xf32>
    %14 = arith.addf %7, %13 : vector<1x256xf32>
    %15 = tpu.iota {dimensions = array<i32: 0>} : vector<5x256xi32>
    %16 = vector.broadcast %3 : vector<1x256xi32> to vector<5x256xi32>
    %17 = arith.cmpi eq, %15, %16 : vector<5x256xi32>
    %cst_6 = arith.constant 0.000000e+00 : f32
    %18 = vector.broadcast %cst_6 : f32 to vector<5x256xf32>
    %19 = arith.select %17, %1, %18 : vector<5x256xi1>, vector<5x256xf32>
    %cst_7 = arith.constant dense<0.000000e+00> : vector<256xf32>
    %20 = vector.multi_reduction <add>, %19, %cst_7 [0] : vector<5x256xf32> to vector<256xf32>
    %21 = vector.shape_cast %20 : vector<256xf32> to vector<1x256xf32>
    %22 = arith.subf %14, %21 : vector<1x256xf32>
    %cst_8 = arith.constant 0.000000e+00 : f32
    %23 = vector.broadcast %cst_8 : f32 to vector<1x256xf32>
    %24 = arith.select %5, %22, %23 : vector<1x256xi1>, vector<1x256xf32>
    %c0_9 = arith.constant 0 : index
    %c0_10 = arith.constant 0 : index
    %c0_11 = arith.constant 0 : index
    %25 = vector.load %arg4[%c0_9, %c0_10, %c0_11] : memref<1x1x256xf32, #tpu.memory_space<vmem>>, vector<1x1x256xf32>
    %26 = vector.shape_cast %25 : vector<1x1x256xf32> to vector<1x256xf32>
    %27 = vector.shape_cast %24 : vector<1x256xf32> to vector<1x1x256xf32>
    tpu.vector_store %arg4[%c0_9, %c0_10, %c0_11], %27 {strides = array<i32>} : memref<1x1x256xf32, #tpu.memory_space<vmem>>, vector<1x1x256xf32>,
    return
  }
  func.func @transform_0(%arg0: i32, %arg1: i32) -> (i32, i32, i32) {
    %c0_i32 = arith.constant 0 : i32
    %c0_i32_0 = arith.constant 0 : i32
    return %arg0, %c0_i32, %arg1 : i32, i32, i32
  }
  func.func @transform_1(%arg0: i32, %arg1: i32) -> (i32, i32, i32) {
    %c0_i32 = arith.constant 0 : i32
    %c0_i32_0 = arith.constant 0 : i32
    return %arg0, %c0_i32, %arg1 : i32, i32, i32
  }
  func.func @transform_2(%arg0: i32, %arg1: i32) -> (i32, i32, i32) {
    %c0_i32 = arith.constant 0 : i32
    %c0_i32_0 = arith.constant 0 : i32
    return %arg0, %c0_i32, %arg1 : i32, i32, i32
  }
}

</mosaic_0001>

<bundles_post_ra>
// kernel: squeeze.11
= control target key start
LH: loop header
LB: loop body
LE: loop exit
PB: predicated region body
PF: predicated region fallthrough
CT: control target
= control target key end

     0   :  { %s89_s8 = smov 112   ;;  %s90_s11 = smov 80   ;;  %vm3_vm0 = vcmask 130048   ;;  %vm9_vm1 = vcmask 1048448   ;;  %vm15_vm2 = vcmask 917248   ;;  %vm21_vm3 = vcmask 786048   ;;  %s142_s0 = inlined_call_operand.vmem [shape: s32[2,1,16,16], index: 0, kind: input, shape index: {}]   ;;  %s143_s1 = inlined_call_operand.vmem [shape: s32[2,1,256], index: 1, kind: output, shape index: {}]  }
   0x1   :  { %v72_v0 = vld [vmem:[%s142_s0 + $0x7] ss:$8 sm:$0xf]   ;;  %v74_v1 = vld [vmem:[%s142_s0 + $0x5] ss:$8 sm:$0xf]  }
   0x2   :  { %7 = vrot.lane.b32.xlu0 %v72_v0, %s89_s8  ;;  %19 = vrot.lane.b32.xlu1 %v74_v1, %s90_s11  ;;  %v73_v2 = vld [vmem:[%s142_s0 + $0x6] ss:$8 sm:$0xf]   ;;  %v75_v3 = vld [vmem:[%s142_s0 + $0x4] ss:$8 sm:$0xf]  }
   0x3   :  { %s91_s16 = smov 96   ;;  %v2_v4 = vld [vmem:[%s142_s0] ss:$8 sm:$0xf]   ;;  %s92_s19 = smov 64   ;;  %vm27_vm4 = vcmask 654848  }
   0x4   :  { %v76_v5 = vld [vmem:[%s142_s0 + $0x3] ss:$8 sm:$0xf]   ;;  %4 = vst.msk [vmem:[#allocation0] ss:$8 sm:$0xf] %vm3_vm0, %v2_v4  }
   0x5   :  { %v77_v6 = vld [vmem:[%s142_s0 + $0x2] ss:$8 sm:$0xf]   ;;  %s93_s24 = smov 48   ;;  %s94_s25 = smov 32   ;;  %vm33_vm5 = vcmask 523648  }
   0x6   :  { %13 = vrot.lane.b32.xlu0 %v73_v2, %s91_s16  ;;  %25 = vrot.lane.b32.xlu1 %v75_v3, %s92_s19  ;;  %v78_v7 = vld [vmem:[%s142_s0 + $0x1] ss:$8 sm:$0xf]   ;;  %s95_s0 = smov 16   ;;  %vm39_vm6 = vcmask 392448   ;;  %vm45_vm7 = vcmask 261248  }
   0xa   :  { %31 = vrot.lane.b32.xlu0 %v76_v5, %s93_s24  ;;  %37 = vrot.lane.b32.xlu1 %v77_v6, %s94_s25 }
   0xe   :  { %43 = vrot.lane.b32.xlu0 %v78_v7, %s95_s0 }
  0x74   :  { %v8_v8 = vpop.permute.xlu0 %7   ;;  %v20_v9 = vpop.permute.xlu1 %19  }
  0x75   :  { %10 = vst.msk [vmem:[#allocation0] ss:$8 sm:$0xf] %vm9_vm1, %v8_v8  }
  0x78   :  { %v14_v10 = vpop.permute.xlu0 %13   ;;  %v26_v11 = vpop.permute.xlu1 %25  }
  0x79   :  { %16 = vst.msk [vmem:[#allocation0] ss:$8 sm:$0xf] %vm15_vm2, %v14_v10  }
  0x7a   :  { %22 = vst.msk [vmem:[#allocation0] ss:$8 sm:$0xf] %vm21_vm3, %v20_v9  }
  0x7b   :  { %28 = vst.msk [vmem:[#allocation0] ss:$8 sm:$0xf] %vm27_vm4, %v26_v11  }
  0x7c   :  { %v32_v12 = vpop.permute.xlu0 %31   ;;  %v38_v13 = vpop.permute.xlu1 %37  }
  0x7d   :  { %34 = vst.msk [vmem:[#allocation0] ss:$8 sm:$0xf] %vm33_vm5, %v32_v12  }
  0x7e   :  { %40 = vst.msk [vmem:[#allocation0] ss:$8 sm:$0xf] %vm39_vm6, %v38_v13  }
  0x80   :  { %v44_v14 = vpop.permute.xlu0 %43  }
  0x81   :  { %46 = vst.msk [vmem:[#allocation0] ss:$8 sm:$0xf] %vm45_vm7, %v44_v14  }
  0x88   :  { %v50_v15 = vld [vmem:[#allocation0] sm:$0x1]  ;;  %v54_v16 = vld [vmem:[#allocation0 + $0x8] sm:$0x1]  ;;  %v59_v17 = vld [vmem:[#allocation0 + $0x10] sm:$0x1] }
  0x89   :  { %52 = vst [vmem:[%s143_s1] sm:$0x1] %v50_v15  ;;  %79 = vst [vmem:[%s143_s1 + $0x1] sm:$0x1] %v54_v16  ;;  %v65_v18 = vld [vmem:[#allocation0 + $0x18] sm:$0x1] }
  0x8a   :  { %80 = vst [vmem:[%s143_s1 + $0x2] sm:$0x1] %v59_v17  ;;  %81 = vst [vmem:[%s143_s1 + $0x3] sm:$0x1] %v65_v18 }

// kernel: _local_impl.4
= control target key start
LH: loop header
LB: loop body
LE: loop exit
PB: predicated region body
PF: predicated region fallthrough
CT: control target
= control target key end

     0   :  { %vm17_vm0 = vcmask 7168   ;;  %v123_v3 = vmov 0.0   ;;  %s176_s0 = inlined_call_operand.vmem [shape: f32[8,256], index: 0, kind: input, shape index: {}]   ;;  %s177_s1 = inlined_call_operand.vmem [shape: f32[8,256], index: 1, kind: input, shape index: {}]   ;;  %s178_s2 = inlined_call_operand.vmem [shape: f32[8,1], index: 2, kind: output, shape index: {0}]   ;;  %s179_s3 = inlined_call_operand.vmem [shape: f32[8,1], index: 3, kind: output, shape index: {1}]  }
   0x1   :  { %v24_v0 = vld [vmem:[%s176_s0] sm:$0xff]  ;;  %v25_v1 = vld [vmem:[%s176_s0 + $0x8] sm:$0xff]  ;;  %19 = vst.msk [vmem:[#allocation2] sm:$0xff] %vm17_vm0, %v123_v3  ;;  %18 = vst.msk [vmem:[#allocation7] sm:$0xff] %vm17_vm0, %v123_v3 }
   0x2   :  { %v26_v2 = vld [vmem:[%s177_s1] sm:$0xff]  ;;  %20 = vst.msk [vmem:[#allocation3] sm:$0xff] %vm17_vm0, %v123_v3  ;;  %21 = vst.msk [vmem:[#allocation4] sm:$0xff] %vm17_vm0, %v123_v3  ;;  %v40_v4 = vadd.f32 %v25_v1, %v24_v0  ;;  %v52_v5 = vmul.f32 %v24_v0, %v24_v0  ;;  %v53_v6 = vmul.f32 %v25_v1, %v25_v1  ;;  %v27_v7 = vld [vmem:[%s177_s1 + $0x8] sm:$0xff] }
   0x3   :  { %22 = vst.msk [vmem:[#allocation5] sm:$0xff] %vm17_vm0, %v123_v3  ;;  %23 = vst.msk [vmem:[#allocation6] sm:$0xff] %vm17_vm0, %v123_v3  ;;  %v60_v8 = vmul.f32 %v26_v2, %v26_v2  ;;  %v46_v9 = vadd.f32 %v27_v7, %v26_v2  ;;  %v61_v10 = vmul.f32 %v27_v7, %v27_v7 }
   0x4   :  { %v68_v11 = vmul.f32 %v26_v2, %v24_v0  ;;  %41 = vadd.xlane.f32.xlu0 %v40_v4  ;;  %v54_v12 = vadd.f32 %v53_v6, %v52_v5  ;;  %v69_v13 = vmul.f32 %v27_v7, %v25_v1  ;;  %v28_v14 = vsub.f32 %v24_v0, %v26_v2 }
   0x5   :  { %v29_v15 = vsub.f32 %v25_v1, %v27_v7  ;;  %v62_v16 = vadd.f32 %v61_v10, %v60_v8 }
   0x6   :  { %55 = vadd.xlane.f32.xlu1 %v54_v12  ;;  %v31_v17 = vmul.f32 %v28_v14, %v28_v14  ;;  %v70_v19 = vadd.f32 %v69_v13, %v68_v11 }
   0x7   :  { %v32_v18 = vmul.f32 %v29_v15, %v29_v15 }
   0x8   :  { %47 = vadd.xlane.f32.xlu0 %v46_v9  ;;  %v39_v21 = vld [vmem:[#allocation2] sm:$0xff]  ;;  %v30_v35 = vld [vmem:[#allocation7] sm:$0xff] }
   0x9   :  { %v33_v20 = vadd.f32 %v32_v18, %v31_v17  ;;  %v51_v23 = vld [vmem:[#allocation4] sm:$0xff]  ;;  %v45_v26 = vld [vmem:[#allocation3] sm:$0xff] }
   0xa   :  { %63 = vadd.xlane.f32.xlu1 %v62_v16  ;;  %v59_v29 = vld [vmem:[#allocation5] sm:$0xff]  ;;  %v67_v32 = vld [vmem:[#allocation6] sm:$0xff] }
   0xc   :  { %71 = vadd.xlane.f32.xlu0 %v70_v19 }
   0xe   :  { %34 = vadd.xlane.f32.xlu1 %v33_v20 }
  0x91   :  { %v42_v22 = vpop.xlane.xlu0 %41 }
  0x92   :  { %v43_v24 = vadd.f32 %v42_v22, %v39_v21 }
  0x93   :  { %v56_v25 = vpop.xlane.xlu1 %55 }
  0x94   :  { %44 = vst.msk [vmem:[#allocation2] sm:$0xff] %vm17_vm0, %v43_v24  ;;  %v57_v27 = vadd.f32 %v56_v25, %v51_v23 }
  0x95   :  { %v48_v28 = vpop.xlane.xlu0 %47 }
  0x96   :  { %58 = vst.msk [vmem:[#allocation4] sm:$0xff] %vm17_vm0, %v57_v27  ;;  %v49_v30 = vadd.f32 %v48_v28, %v45_v26 }
  0x97   :  { %v64_v31 = vpop.xlane.xlu1 %63 }
  0x98   :  { %50 = vst.msk [vmem:[#allocation3] sm:$0xff] %vm17_vm0, %v49_v30  ;;  %v65_v33 = vadd.f32 %v64_v31, %v59_v29 }
  0x99   :  { %v72_v34 = vpop.xlane.xlu0 %71 }
  0x9a   :  { %66 = vst.msk [vmem:[#allocation5] sm:$0xff] %vm17_vm0, %v65_v33  ;;  %v73_v36 = vadd.f32 %v72_v34, %v67_v32 }
  0x9b   :  { %v80_v37 = vld [vmem:[#allocation2] sm:$0xff]  ;;  %v35_v38 = vpop.xlane.xlu1 %34 }
  0x9c   :  { %v83_v39 = vmul.f32 %v80_v37, %v80_v37  ;;  %74 = vst.msk [vmem:[#allocation6] sm:$0xff] %vm17_vm0, %v73_v36  ;;  %v36_v40 = vadd.f32 %v35_v38, %v30_v35 }
  0x9d   :  { %v82_v41 = vld [vmem:[#allocation4] sm:$0xff] }
  0x9e   :  { %v84_v42 = vmul.f32 0.00390625, %v83_v39  ;;  %38 = vst.msk [vmem:[#allocation7] sm:$0xff] %vm17_vm0, %v36_v40 }
  0x9f   :  { %v81_v43 = vld [vmem:[#allocation3] sm:$0xff] }
  0xa0   :  { %v85_v44 = vsub.f32 %v82_v41, %v84_v42  ;;  %v88_v45 = vmul.f32 %v81_v43, %v81_v43  ;;  %v93_v54 = vmul.f32 %v81_v43, %v80_v37 }
  0xa1   :  { %v87_v46 = vld [vmem:[#allocation5] sm:$0xff] }
  0xa2   :  { %v86_v47 = vmax.f32 %v85_v44, 0.0  ;;  %v89_v48 = vmul.f32 0.00390625, %v88_v45  ;;  %v94_v55 = vmul.f32 0.00390625, %v93_v54 }
  0xa3   :  { %v92_v57 = vld [vmem:[#allocation6] sm:$0xff] }
  0xa4   :  { %v96_v49 = vadd.f32 1e-16, %v86_v47  ;;  %v90_v50 = vsub.f32 %v87_v46, %v89_v48  ;;  %v95_v59 = vsub.f32 %v92_v57, %v94_v55 }
  0xa5   :  { %v78_v51 = vld [vmem:[#allocation7] sm:$0xff] }
  0xa6   :  { %119 = vrsqrt.f32 %v96_v49  ;;  %v91_v52 = vmax.f32 %v90_v50, 0.0  ;;  %79 = vst.msk [vmem:[%s178_s2] sm:$0xff] %vm17_vm0, %v78_v51  ;;  %v105_v1 = vmul.f32 2.0, %v95_v59 }
  0xa8   :  { %v98_v53 = vadd.f32 1e-16, %v91_v52 }
  0xaa   :  { %121 = vrsqrt.f32 %v98_v53 }
  0xb0   :  { %v120_v56 = vpop.eup %119 }
  0xb1   :  { %v100_v58 = vmul.f32 %v120_v56, %v86_v47 }
  0xb3   :  { %v101_v63 = vmul.f32 %v120_v56, %v100_v58 }
  0xb4   :  { %v122_v60 = vpop.eup %121 }
  0xb5   :  { %v102_v61 = vmul.f32 %v122_v60, %v91_v52  ;;  %v106_v62 = vmul.f32 %v122_v60, %v120_v56 }
  0xb7   :  { %v103_v0 = vmul.f32 %v122_v60, %v102_v61  ;;  %v107_v3 = vmul.f32 %v106_v62, %v105_v1 }
  0xb9   :  { %v104_v2 = vadd.f32 %v103_v0, %v101_v63 }
  0xbb   :  { %v108_v4 = vsub.f32 %v104_v2, %v107_v3 }
  0xbd   :  { %109 = vst.msk [vmem:[%s179_s3] sm:$0xff] %vm17_vm0, %v108_v4 }

// kernel: _local_impl.5
= control target key start
LH: loop header
LB: loop body
LE: loop exit
PB: predicated region body
PF: predicated region fallthrough
CT: control target
= control target key end

     0   :  { %vm40_vm0 = vcmask 523264   ;;  %vm17_vm1 = vcmask 7168   ;;  %v202_v3 = vmov 0.0   ;;  %s292_s1 = inlined_call_operand.vmem [shape: f32[16,64], index: 1, kind: input, shape index: {}]   ;;  %s293_s0 = inlined_call_operand.vmem [shape: f32[16,64], index: 0, kind: input, shape index: {}]   ;;  %s294_s2 = inlined_call_operand.vmem [shape: f32[16,1], index: 2, kind: output, shape index: {0}]   ;;  %s295_s3 = inlined_call_operand.vmem [shape: f32[16,1], index: 3, kind: output, shape index: {1}]  }
   0x1   :  { %v32_v0 = vld [vmem:[%s292_s1] sm:$0xff]  ;;  %v33_v2 = vld [vmem:[%s292_s1 + $0x8] sm:$0xff]  ;;  %22 = vst.msk [vmem:[#allocation3] sm:$0xff] %vm17_vm1, %v202_v3  ;;  %18 = vst.msk [vmem:[#allocation7] sm:$0xff] %vm17_vm1, %v202_v3 }
   0x2   :  { %v30_v1 = vld [vmem:[%s293_s0] sm:$0xff]  ;;  %19 = vst.msk [vmem:[#allocation7 + $0x8] sm:$0xff] %vm17_vm1, %v202_v3  ;;  %20 = vst.msk [vmem:[#allocation2] sm:$0xff] %vm17_vm1, %v202_v3  ;;  %v66_v4 = vsel %vm40_vm0, %v32_v0, 0.0  ;;  %v31_v6 = vld [vmem:[%s293_s0 + $0x8] sm:$0xff]  ;;  %v69_v7 = vsel %vm40_vm0, %v33_v2, 0.0  ;;  %v93_v13 = vmul.f32 %v33_v2, %v33_v2  ;;  %v92_v14 = vmul.f32 %v32_v0, %v32_v0 }
   0x3   :  { %21 = vst.msk [vmem:[#allocation2 + $0x8] sm:$0xff] %vm17_vm1, %v202_v3  ;;  %23 = vst.msk [vmem:[#allocation3 + $0x8] sm:$0xff] %vm17_vm1, %v202_v3  ;;  %v54_v5 = vsel %vm40_vm0, %v30_v1, 0.0  ;;  %67 = vadd.xlane.f32.xlu1 %v66_v4  ;;  %v57_v8 = vsel %vm40_vm0, %v31_v6, 0.0  ;;  %v79_v9 = vmul.f32 %v31_v6, %v31_v6  ;;  %v78_v10 = vmul.f32 %v30_v1, %v30_v1 }
   0x4   :  { %24 = vst.msk [vmem:[#allocation4] sm:$0xff] %vm17_vm1, %v202_v3  ;;  %25 = vst.msk [vmem:[#allocation4 + $0x8] sm:$0xff] %vm17_vm1, %v202_v3  ;;  %55 = vadd.xlane.f32.xlu0 %v54_v5  ;;  %v107_v15 = vmul.f32 %v33_v2, %v31_v6  ;;  %v106_v16 = vmul.f32 %v32_v0, %v30_v1  ;;  %v97_v17 = vsel %vm40_vm0, %v93_v13, 0.0  ;;  %v94_v18 = vsel %vm40_vm0, %v92_v14, 0.0 }
   0x5   :  { %26 = vst.msk [vmem:[#allocation5] sm:$0xff] %vm17_vm1, %v202_v3  ;;  %27 = vst.msk [vmem:[#allocation5 + $0x8] sm:$0xff] %vm17_vm1, %v202_v3  ;;  %v83_v11 = vsel %vm40_vm0, %v79_v9, 0.0  ;;  %v80_v12 = vsel %vm40_vm0, %v78_v10, 0.0  ;;  %v35_v19 = vsub.f32 %v31_v6, %v33_v2  ;;  %v34_v20 = vsub.f32 %v30_v1, %v32_v0 }
   0x6   :  { %28 = vst.msk [vmem:[#allocation6] sm:$0xff] %vm17_vm1, %v202_v3  ;;  %29 = vst.msk [vmem:[#allocation6 + $0x8] sm:$0xff] %vm17_vm1, %v202_v3  ;;  %v111_v21 = vsel %vm40_vm0, %v107_v15, 0.0  ;;  %v108_v22 = vsel %vm40_vm0, %v106_v16, 0.0 }
   0x7   :  { %70 = vadd.xlane.f32.xlu1 %v69_v7  ;;  %v39_v23 = vmul.f32 %v35_v19, %v35_v19  ;;  %v38_v24 = vmul.f32 %v34_v20, %v34_v20 }
   0x8   :  { %58 = vadd.xlane.f32.xlu0 %v57_v8  ;;  %v64_v27 = vld [vmem:[#allocation3] sm:$0xff] }
   0x9   :  { %v44_v25 = vsel %vm40_vm0, %v39_v23, 0.0  ;;  %v41_v26 = vsel %vm40_vm0, %v38_v24, 0.0  ;;  %v52_v28 = vld [vmem:[#allocation2] sm:$0xff]  ;;  %v37_v1 = vld [vmem:[#allocation7 + $0x8] sm:$0xff]  ;;  %v36_v6 = vld [vmem:[#allocation7] sm:$0xff] }
   0xa   :  { %v65_v33 = vld [vmem:[#allocation3 + $0x8] sm:$0xff]  ;;  %v53_v34 = vld [vmem:[#allocation2 + $0x8] sm:$0xff] }
   0xb   :  { %84 = vadd.xlane.f32.xlu1 %v83_v11  ;;  %v77_v39 = vld [vmem:[#allocation4 + $0x8] sm:$0xff]  ;;  %v76_v40 = vld [vmem:[#allocation4] sm:$0xff] }
   0xc   :  { %81 = vadd.xlane.f32.xlu0 %v80_v12  ;;  %v91_v46 = vld [vmem:[#allocation5 + $0x8] sm:$0xff]  ;;  %v90_v47 = vld [vmem:[#allocation5] sm:$0xff] }
   0xd   :  { %v105_v55 = vld [vmem:[#allocation6 + $0x8] sm:$0xff]  ;;  %v104_v58 = vld [vmem:[#allocation6] sm:$0xff] }
   0xf   :  { %98 = vadd.xlane.f32.xlu1 %v97_v17 }
  0x10   :  { %95 = vadd.xlane.f32.xlu0 %v94_v18 }
  0x13   :  { %112 = vadd.xlane.f32.xlu1 %v111_v21 }
  0x14   :  { %109 = vadd.xlane.f32.xlu0 %v108_v22 }
  0x17   :  { %45 = vadd.xlane.f32.xlu1 %v44_v25 }
  0x18   :  { %42 = vadd.xlane.f32.xlu0 %v41_v26 }
  0x90   :  { %v68_v29 = vpop.xlane.xlu1 %67 }
  0x91   :  { %v56_v30 = vpop.xlane.xlu0 %55  ;;  %v72_v31 = vadd.f32 %v68_v29, %v64_v27 }
  0x92   :  { %v60_v32 = vadd.f32 %v56_v30, %v52_v28 }
  0x93   :  { %74 = vst.msk [vmem:[#allocation3] sm:$0xff] %vm17_vm1, %v72_v31 }
  0x94   :  { %62 = vst.msk [vmem:[#allocation2] sm:$0xff] %vm17_vm1, %v60_v32  ;;  %v71_v35 = vpop.xlane.xlu1 %70 }
  0x95   :  { %v59_v36 = vpop.xlane.xlu0 %58  ;;  %v73_v37 = vadd.f32 %v71_v35, %v65_v33 }
  0x96   :  { %v61_v38 = vadd.f32 %v59_v36, %v53_v34 }
  0x97   :  { %75 = vst.msk [vmem:[#allocation3 + $0x8] sm:$0xff] %vm17_vm1, %v73_v37 }
  0x98   :  { %63 = vst.msk [vmem:[#allocation2 + $0x8] sm:$0xff] %vm17_vm1, %v61_v38  ;;  %v85_v41 = vpop.xlane.xlu1 %84 }
  0x99   :  { %v82_v42 = vpop.xlane.xlu0 %81  ;;  %v87_v43 = vadd.f32 %v85_v41, %v77_v39 }
  0x9a   :  { %v86_v44 = vadd.f32 %v82_v42, %v76_v40  ;;  %v127_v56 = vld [vmem:[#allocation3] sm:$0xff] }
  0x9b   :  { %v263_v45 = vld [vmem:[#allocation2] sm:$0xff]  ;;  %89 = vst.msk [vmem:[#allocation4 + $0x8] sm:$0xff] %vm17_vm1, %v87_v43  ;;  %v141_v2 = vmul.f32 %v127_v56, %v127_v56 }
  0x9c   :  { %88 = vst.msk [vmem:[#allocation4] sm:$0xff] %vm17_vm1, %v86_v44  ;;  %v99_v48 = vpop.xlane.xlu1 %98  ;;  %v131_v50 = vmul.f32 %v263_v45, %v263_v45  ;;  %v151_v30 = vmul.f32 %v127_v56, %v263_v45 }
  0x9d   :  { %v96_v49 = vpop.xlane.xlu0 %95  ;;  %v101_v51 = vadd.f32 %v99_v48, %v91_v46  ;;  %v143_v16 = vmul.f32 0.015625, %v141_v2 }
  0x9e   :  { %v128_v52 = vld [vmem:[#allocation3 + $0x8] sm:$0xff]  ;;  %v100_v54 = vadd.f32 %v96_v49, %v90_v47  ;;  %v133_v62 = vmul.f32 0.015625, %v131_v50  ;;  %v153_v36 = vmul.f32 0.015625, %v151_v30 }
  0x9f   :  { %v126_v53 = vld [vmem:[#allocation2 + $0x8] sm:$0xff]  ;;  %103 = vst.msk [vmem:[#allocation5 + $0x8] sm:$0xff] %vm17_vm1, %v101_v51  ;;  %v142_v59 = vmul.f32 %v128_v52, %v128_v52 }
  0xa0   :  { %v132_v57 = vmul.f32 %v126_v53, %v126_v53  ;;  %102 = vst.msk [vmem:[#allocation5] sm:$0xff] %vm17_vm1, %v100_v54  ;;  %v113_v60 = vpop.xlane.xlu1 %112  ;;  %v152_v29 = vmul.f32 %v128_v52, %v126_v53 }
  0xa1   :  { %v110_v61 = vpop.xlane.xlu0 %109  ;;  %v115_v0 = vadd.f32 %v113_v60, %v105_v55  ;;  %v144_v9 = vmul.f32 0.015625, %v142_v59 }
  0xa2   :  { %v134_v63 = vmul.f32 0.015625, %v132_v57  ;;  %v130_v3 = vld [vmem:[#allocation4 + $0x8] sm:$0xff]  ;;  %v114_v5 = vadd.f32 %v110_v61, %v104_v58  ;;  %v154_v34 = vmul.f32 0.015625, %v152_v29 }
  0xa3   :  { %v129_v4 = vld [vmem:[#allocation4] sm:$0xff]  ;;  %117 = vst.msk [vmem:[#allocation6 + $0x8] sm:$0xff] %vm17_vm1, %v115_v0 }
  0xa4   :  { %v136_v7 = vsub.f32 %v130_v3, %v134_v63  ;;  %v135_v8 = vsub.f32 %v129_v4, %v133_v62  ;;  %116 = vst.msk [vmem:[#allocation6] sm:$0xff] %vm17_vm1, %v114_v5  ;;  %v46_v10 = vpop.xlane.xlu1 %45 }
  0xa5   :  { %v43_v11 = vpop.xlane.xlu0 %42  ;;  %v48_v14 = vadd.f32 %v46_v10, %v37_v1 }
  0xa6   :  { %v138_v12 = vmax.f32 %v136_v7, 0.0  ;;  %v137_v13 = vmax.f32 %v135_v8, 0.0  ;;  %v47_v15 = vadd.f32 %v43_v11, %v36_v6  ;;  %v140_v17 = vld [vmem:[#allocation5 + $0x8] sm:$0xff] }
  0xa7   :  { %v146_v20 = vsub.f32 %v140_v17, %v144_v9  ;;  %v139_v21 = vld [vmem:[#allocation5] sm:$0xff]  ;;  %51 = vst.msk [vmem:[#allocation7 + $0x8] sm:$0xff] %vm17_vm1, %v48_v14 }
  0xa8   :  { %v158_v18 = vadd.f32 1e-16, %v138_v12  ;;  %v157_v19 = vadd.f32 1e-16, %v137_v13  ;;  %50 = vst.msk [vmem:[#allocation7] sm:$0xff] %vm17_vm1, %v47_v15  ;;  %v145_v22 = vsub.f32 %v139_v21, %v143_v16 }
  0xa9   :  { %v148_v23 = vmax.f32 %v146_v20, 0.0 }
  0xaa   :  { %194 = vrsqrt.f32 %v158_v18  ;;  %v147_v24 = vmax.f32 %v145_v22, 0.0  ;;  %v150_v32 = vld [vmem:[#allocation6 + $0x8] sm:$0xff] }
  0xab   :  { %196 = vrsqrt.f32 %v157_v19  ;;  %v162_v25 = vadd.f32 1e-16, %v148_v23  ;;  %v149_v35 = vld [vmem:[#allocation6] sm:$0xff]  ;;  %v156_v38 = vsub.f32 %v150_v32, %v154_v34 }
  0xac   :  { %v161_v26 = vadd.f32 1e-16, %v147_v24  ;;  %v155_v41 = vsub.f32 %v149_v35, %v153_v36 }
  0xad   :  { %198 = vrsqrt.f32 %v162_v25  ;;  %v176_v50 = vmul.f32 2.0, %v156_v38 }
  0xae   :  { %200 = vrsqrt.f32 %v161_v26  ;;  %v122_v27 = vld [vmem:[#allocation7 + $0x8] sm:$0xff]  ;;  %v175_v52 = vmul.f32 2.0, %v155_v41 }
  0xaf   :  { %v121_v28 = vld [vmem:[#allocation7] sm:$0xff]  ;;  %124 = vst.msk [vmem:[%s294_s2 + $0x8] sm:$0xff] %vm17_vm1, %v122_v27 }
  0xb0   :  { %123 = vst.msk [vmem:[%s294_s2] sm:$0xff] %vm17_vm1, %v121_v28 }
  0xb4   :  { %v195_v31 = vpop.eup %194 }
  0xb5   :  { %v197_v33 = vpop.eup %196  ;;  %v166_v37 = vmul.f32 %v195_v31, %v138_v12 }
  0xb6   :  { %v165_v40 = vmul.f32 %v197_v33, %v137_v13 }
  0xb7   :  { %v199_v39 = vpop.eup %198  ;;  %v168_v48 = vmul.f32 %v195_v31, %v166_v37 }
  0xb8   :  { %v201_v42 = vpop.eup %200  ;;  %v170_v43 = vmul.f32 %v199_v39, %v148_v23  ;;  %v178_v44 = vmul.f32 %v199_v39, %v195_v31  ;;  %v167_v45 = vmul.f32 %v197_v33, %v165_v40 }
  0xb9   :  { %v169_v46 = vmul.f32 %v201_v42, %v147_v24  ;;  %v177_v47 = vmul.f32 %v201_v42, %v197_v33 }
  0xba   :  { %v172_v49 = vmul.f32 %v199_v39, %v170_v43  ;;  %v180_v54 = vmul.f32 %v178_v44, %v176_v50 }
  0xbb   :  { %v171_v51 = vmul.f32 %v201_v42, %v169_v46  ;;  %v179_v56 = vmul.f32 %v177_v47, %v175_v52 }
  0xbc   :  { %v174_v53 = vadd.f32 %v172_v49, %v168_v48 }
  0xbd   :  { %v173_v55 = vadd.f32 %v171_v51, %v167_v45 }
  0xbe   :  { %v182_v57 = vsub.f32 %v174_v53, %v180_v54 }
  0xbf   :  { %v181_v58 = vsub.f32 %v173_v55, %v179_v56 }
  0xc0   :  { %184 = vst.msk [vmem:[%s295_s3 + $0x8] sm:$0xff] %vm17_vm1, %v182_v57 }
  0xc1   :  { %183 = vst.msk [vmem:[%s295_s3] sm:$0xff] %vm17_vm1, %v181_v58 }

// kernel: _local_impl.6
= control target key start
LH: loop header
LB: loop body
LE: loop exit
PB: predicated region body
PF: predicated region fallthrough
CT: control target
= control target key end

     0   :  { %vm18_vm0 = vcmask 7168   ;;  %v85_v5 = vmov 0.0   ;;  %s138_s0 = inlined_call_operand.vmem [shape: f32[6,256], index: 0, kind: input, shape index: {}]   ;;  %s139_s1 = inlined_call_operand.vmem [shape: f32[6,256], index: 1, kind: input, shape index: {}]   ;;  %s140_s2 = inlined_call_operand.vmem [shape: f32[8,1], index: 2, kind: output, shape index: {0}]   ;;  %s141_s3 = inlined_call_operand.hbm [shape: f32[8,1], index: 3, kind: output, shape index: {1}]  }
   0x1   :  { %v20_v0 = vld [vmem:[%s138_s0] sm:$0xff]  ;;  %v21_v1 = vld [vmem:[%s138_s0 + $0x8] sm:$0xff]  ;;  %19 = vst.msk [vmem:[#allocation7] sm:$0xff] %vm18_vm0, %v85_v5  ;;  %40 = vst.msk [vmem:[#allocation8] sm:$0xff] %vm18_vm0, %v85_v5 }
   0x2   :  { %v22_v2 = vld [vmem:[%s139_s1] sm:$0xff]  ;;  %v23_v3 = vld [vmem:[%s139_s1 + $0x8] sm:$0xff] }
   0x3   :  { %v24_v4 = vsub.f32 %v20_v0, %v22_v2 }
   0x4   :  { %9 = vsyncpa [#allocation9], 0  ;;  %v25_v6 = vsub.f32 %v21_v1, %v23_v3  ;;  %s86_s0 = smov [#allocation8]  }
   0x5   :  { %v27_v7 = vmul.f32 %v24_v4, %v24_v4  ;;  %s49_s20 = sshll.u32 %s86_s0, 4  ;;  %s50_s20 = int_to_ptr.vmem [resolvable:$true] %s49_s20 }
   0x6   :  { %v28_v8 = vmul.f32 %v25_v6, %v25_v6  ;;  %s61_s21 = scalar_lea.vmem %s50_s20, 128  ;;  %p66_p1 = scmp.lt.s32.totalorder %s50_s20, %s50_s20 }
   0x7   :  { %p62_p0 = scmp.ne.s32.totalorder %s50_s20, %s61_s21  ;;  %p67_p2 = scmp.lt.s32.totalorder %s61_s21, %s61_s21 }
   0x8   :  { %v29_v9 = vadd.f32 %v28_v8, %v27_v7 }
   0x9   :  { %p68_p3 = por %p67_p2, %p66_p1 }
   0xa   :  { %30 = vadd.xlane.f32.xlu0 %v29_v9 }
   0xb   :  { %p69_p4 = pnand %p68_p3, %p62_p0 }
   0xd   :  { %72 = shalt.err (!%p69_p4)
}
   0xe   :  { %s73_s23 = scalar_lea.hbm %s141_s3, 128 }
   0xf   :  { %p74_p5 = scmp.ne.s32.totalorder %s141_s3, %s73_s23  ;;  %p77_p6 = scmp.lt.u32.totalorder %s73_s23, %s141_s3 }
  0x11   :  { %p79_p7 = pnand %p77_p6, %p74_p5 }
  0x13   :  { %82 = shalt.err (!%p79_p7)
}
  0x14   :  { %52 = dma.vmem_to_hbm [thread:$0]  %s50_s20, 128, %s141_s3, [#allocation9]   ;;  %v26_v10 = vld [vmem:[#allocation7] sm:$0xff] }
  0x97   :  { %v31_v11 = vpop.xlane.xlu0 %30 }
  0x98   :  { %v32_v12 = vadd.f32 %v31_v11, %v26_v10 }
  0x9a   :  { %34 = vst.msk [vmem:[#allocation7] sm:$0xff] %vm18_vm0, %v32_v12 }
  0xa1   :  { %v38_v13 = vld [vmem:[#allocation7] sm:$0xff] }
  0xa2   :  { %39 = vst.msk [vmem:[%s140_s2] sm:$0xff] %vm18_vm0, %v38_v13 }
  0xa3   :  { %83 = dma.done.wait [#allocation9], 128  }
  0xa4   :  { %84 = vsyncadd [#allocation9], 4294967168 }
  0xa5   :  { %58 = vsyncpa [#allocation9], 1 }

// kernel: _local_impl.7
= control target key start
LH: loop header
LB: loop body
LE: loop exit
PB: predicated region body
PF: predicated region fallthrough
CT: control target
= control target key end

     0   :  { %s494_s9 = smov 0   ;;  %s496_s10 = smov 0   ;;  %s546_s0 = inlined_call_operand.vmem [shape: f32[2,5,256], index: 0, kind: input, shape index: {}]   ;;  %s547_s1 = inlined_call_operand.vmem [shape: s32[2,1,256], index: 1, kind: input, shape index: {}]   ;;  %s548_s2 = inlined_call_operand.vmem [shape: f32[2,1,256], index: 2, kind: output, shape index: {}]  }
   0x1   :  { %s498_s11 = smov 0  }
   0x2 LB: > { %s24_s12 = sadd.s32 1, %s472_s10  ;;  %p413_p0 = scmp.ge.s32.totalorder %s476_s11, 1  ;;  %s476_s11 = sphi %s498_s11, %s12_s11   ;;  %s472_s10 = sphi %s496_s10, %s550_s10   ;;  %s468_s9 = sphi %s494_s9, %s549_s9  }
   0x3   : > { %p26_p1 = scmp.ge.s32.totalorder %s24_s12, 2  ;;  %p149_p2 = scmp.lt.s32.totalorder %s476_s11, 3 }
   0x5   : > { %s552_s12 = smov (%p26_p1, %s24_s12), 0  ;;  %p150_p3 = pnand %p413_p0, %p149_p2 }
   0x6   : > { %p187_p4 = scmp.lt.s32.totalorder (!%p150_p3), %s468_s9, 1  ;;  %vm218_vm0 = vcmask (!%p150_p3), 1044480   ;;  %v259_v12 = vlaneseq (!%p150_p3)  ;;  %v478_v57 = vmov (!%p150_p3), 1966171168  }
   0x7   : > { %153 = sbr.rel (%p150_p3) target bundleno = 85 (0x55), region = 28  ;;  %v293_v58 = vunpack.c.l.s4 (!%p150_p3), %v478_v57 }
   0x8   : > { %v260_v17 = vshrl.u32 (!%p150_p3), %v259_v12, 7  ;;  %vm310_vm4 = vcmp.lt.s32.totalorder (!%p150_p3), %v259_v12, 256 }
   0xa   : > { %v263_v22 = vsub.s32 (!%p150_p3), 0, %v260_v17  ;;  %v267_v24 = vsub.s32 (!%p150_p3), 1, %v260_v17 }
   0xe   : > { %s554_s9 = smov (!%p187_p4, %s468_s9), 1 }
   0xf   : > { %s420_s13 = sshll.u32 %s554_s9, 4  ;;  %s416_s17 = sshll.u32 %s554_s9, 1 }
  0x10   : > { %s194_s16 = scalar_lea.vmem %s546_s0, %s420_s13  ;;  %s203_s20 = scalar_lea.vmem %s547_s1, %s416_s17 }
  0x11   : > { %v214_v0 = vld [vmem:[%s194_s16] sm:$0x1f]  ;;  %v215_v1 = vld [vmem:[%s194_s16 + $0x8] sm:$0x1f]  ;;  %s212_s23 = scalar_lea.vmem %s548_s2, %s416_s17 }
  0x12   : > { %v219_v2 = vsel %vm218_vm0, %v214_v0, -inf  ;;  %v226_v3 = vsel %vm218_vm0, %v215_v1, -inf  ;;  %v216_v23 = vld [vmem:[%s203_s20] sm:$0x3] }
  0x13   : > { %v220_v4 = vrot.slane %v219_v2, 4  ;;  %v227_v5 = vrot.slane %v226_v3, 4  ;;  %v264_v25 = vrot.slane %v216_v23, %v263_v22  ;;  %v268_v26 = vrot.slane %v216_v23, %v267_v24 }
  0x14   : > { %vm217_vm3 = vcmp.ne.s32.totalorder %v216_v23, 4294967196 }
  0x15   : > { %v221_v6 = vmax.f32 %v219_v2, %v220_v4  ;;  %v228_v7 = vmax.f32 %v226_v3, %v227_v5  ;;  %vm269_vm1 = vcmp.eq.s32.totalorder %v260_v17, %v264_v25  ;;  %vm270_vm2 = vcmp.eq.s32.totalorder %v260_v17, %v268_v26 }
  0x16   : > { %v271_v27 = vsel %vm269_vm1, %v214_v0, 0.0  ;;  %v272_v29 = vsel %vm270_vm2, %v215_v1, 0.0 }
  0x17   : > { %v222_v8 = vrot.slane %v221_v6, 2  ;;  %v229_v9 = vrot.slane %v228_v7, 2  ;;  %v273_v34 = vsel %vm218_vm0, %v271_v27, 0.0  ;;  %v280_v36 = vsel %vm218_vm0, %v272_v29, 0.0 }
  0x18   : > { %v274_v39 = vrot.slane %v273_v34, 4  ;;  %v281_v41 = vrot.slane %v280_v36, 4 }
  0x19   : > { %v223_v10 = vmax.f32 %v221_v6, %v222_v8  ;;  %v230_v11 = vmax.f32 %v228_v7, %v229_v9 }
  0x1a   : > { %v275_v45 = vadd.f32 %v274_v39, %v273_v34  ;;  %v282_v47 = vadd.f32 %v281_v41, %v280_v36 }
  0x1b   : > { %v224_v13 = vrot.slane %v223_v10, 1  ;;  %v231_v14 = vrot.slane %v230_v11, 1 }
  0x1c   : > { %v276_v51 = vrot.slane %v275_v45, 2  ;;  %v283_v52 = vrot.slane %v282_v47, 2 }
  0x1d   : > { %v225_v15 = vmax.f32 %v223_v10, %v224_v13  ;;  %v232_v16 = vmax.f32 %v230_v11, %v231_v14 }
  0x1e   : > { %v277_v53 = vadd.f32 %v276_v51, %v275_v45  ;;  %v284_v54 = vadd.f32 %v283_v52, %v282_v47 }
  0x1f   : > { %v233_v18 = vsub.f32 %v214_v0, %v225_v15  ;;  %v234_v19 = vsub.f32 %v215_v1, %v232_v16  ;;  %v294_v1 = vunpack.c.0.s8 %v293_v58 }
  0x20   : > { %v278_v55 = vrot.slane %v277_v53, 1  ;;  %v285_v56 = vrot.slane %v284_v54, 1 }
  0x21   : > { %v235_v20 = vmul.f32 1.442695, %v233_v18  ;;  %v237_v21 = vmul.f32 1.442695, %v234_v19  ;;  %v297_v6 = vsub.s32 %v294_v1, %v260_v17 }
  0x22   : > { %v279_v62 = vadd.f32 %v278_v55, %v277_v53  ;;  %v286_v0 = vadd.f32 %v285_v56, %v284_v54 }
  0x23   : > { %446 = vpow2.f32 %v235_v20 }
  0x24   : > { %448 = vpow2.f32 %v237_v21 }
  0x2d   : > { %v447_v28 = vpop.eup %446 }
  0x2e   : > { %v449_v30 = vpop.eup %448  ;;  %v239_v31 = vsel %vm218_vm0, %v447_v28, 0.0 }
  0x2f   : > { %v240_v32 = vrot.slane %v239_v31, 4  ;;  %v246_v33 = vsel %vm218_vm0, %v449_v30, 0.0 }
  0x30   : > { %v247_v35 = vrot.slane %v246_v33, 4 }
  0x31   : > { %v241_v37 = vadd.f32 %v240_v32, %v239_v31 }
  0x32   : > { %v248_v38 = vadd.f32 %v247_v35, %v246_v33 }
  0x33   : > { %v242_v40 = vrot.slane %v241_v37, 2 }
  0x34   : > { %v249_v42 = vrot.slane %v248_v38, 2 }
  0x35   : > { %v243_v43 = vadd.f32 %v242_v40, %v241_v37 }
  0x36   : > { %v250_v44 = vadd.f32 %v249_v42, %v248_v38 }
  0x37   : > { %v244_v46 = vrot.slane %v243_v43, 1 }
  0x38   : > { %v251_v48 = vrot.slane %v250_v44, 1 }
  0x39   : > { %v245_v49 = vadd.f32 %v244_v46, %v243_v43 }
  0x3a   : > { %v252_v50 = vadd.f32 %v251_v48, %v250_v44 }
  0x3b   : > { %450 = vlog2.f32 %v245_v49 }
  0x3c   : > { %452 = vlog2.f32 %v252_v50 }
  0x45   : > { %v451_v59 = vpop.eup %450 }
  0x46   : > { %v453_v60 = vpop.eup %452  ;;  %v254_v61 = vmul.f32 0.6931472, %v451_v59 }
  0x47   : > { %v256_v63 = vmul.f32 0.6931472, %v453_v60 }
  0x48   : > { %v257_v2 = vadd.f32 %v254_v61, %v225_v15 }
  0x49   : > { %v258_v3 = vadd.f32 %v256_v63, %v232_v16 }
  0x4a   : > { %v287_v4 = vsub.f32 %v257_v2, %v279_v62 }
  0x4b   : > { %v288_v5 = vsub.f32 %v258_v3, %v286_v0 }
  0x4d   : > { %v291_v7 = vcombine.low %v287_v4, %v288_v5 }
  0x4f   : > { %v298_v8 = vrot.slane %v291_v7, %v297_v6 }
  0x51   : > { %v305_v9 = vrot.slane %v298_v8, %v297_v6 }
  0x53   : > { %v307_v10 = vsel %vm217_vm3, %v305_v9, 0.0 }
  0x54   : > { %312 = vst.msk [vmem:[%s212_s23] sm:$0x3] %vm310_vm4, %v307_v10 }
  0x55 PF: > { %s12_s11 = sadd.s32 1, %s476_s11   ;;  %s549_s9 = smov %s472_s10 }
  0x56   : > { %p9_p5 = scmp.ge.s32.totalorder %s12_s11, 4   ;;  %s550_s10 = smov %s552_s12 }
  0x58   :  { %11 = sbr.rel (!%p9_p5) target bundleno = 2 (0x2), region = 61 }

</bundles_post_ra>
